<compile_context>
chip_gen: v6e
topology: v6e:2x2x1
jax: 0.10.0
libtpu: 0.0.40
codegen_flags: <defaults>
</compile_context>

<pallas_src>
import functools

import jax
import jax.numpy as jnp
from jax.experimental import pallas as pl
from jax.experimental.pallas import tpu as pltpu


def _conv2d_kernel(x_ref, w_ref, b_ref, o_ref, lhs_ref, *,
                   KH, KW, sh, sw, dh, dw, TOH, OW, Cin, Cout_pad):
    """One (sample, OH-row-tile) grid step.

    x_ref:   (1, Hp, Wp, Cin)       padded NHWC sample (bf16), revisited over mt
    w_ref:   (KH*KW*Cin, Cout_pad)  tap-major weight matrix (bf16)
    b_ref:   (1, Cout_pad)          f32 bias
    o_ref:   (1, TOH*OW, Cout_pad)  lane-dense output tile
    lhs_ref: (TOH*OW, KH*KW*Cin)    VMEM scratch: im2col tile
    """
    mt = pl.program_id(1)
    TM = TOH * OW
    IHt = (TOH - 1) * sh + dh * (KH - 1) + 1           # input rows this tile needs
    row0 = pl.multiple_of(mt * (TOH * sh), TOH * sh)
    xt = x_ref[0, pl.ds(row0, IHt), :, :]               # (IHt, Wp, Cin)

    hs = (TOH - 1) * sh + 1
    ws = (OW - 1) * sw + 1
    # Build the im2col tile in VMEM (tap-major along K), then ONE fat MXU call.
    for kh in range(KH):                                 # static unroll over taps
        for kw in range(KW):
            h0, w0 = kh * dh, kw * dw
            if sh == 1 and sw == 1:
                patch = jax.lax.slice(xt, (h0, w0, 0), (h0 + TOH, w0 + OW, Cin))
            else:
                # TODO(synk): move stride decimation to the wrapper / DMA instead
                # of a strided slice on the VMEM tile (untested path here).
                patch = jax.lax.slice(xt, (h0, w0, 0),
                                      (h0 + hs, w0 + ws, Cin), (sh, sw, 1))
            t = kh * KW + kw
            lhs_ref[:, t * Cin:(t + 1) * Cin] = patch.reshape(TM, Cin)

    acc = jnp.dot(lhs_ref[...], w_ref[...], preferred_element_type=jnp.float32)
    acc = acc + b_ref[...]                               # f32 bias, broadcast on TM
    o_ref[...] = acc.reshape(1, TM, Cout_pad).astype(o_ref.dtype)


def _pick_row_tile(OH, OW, Cout_pad):
    """Largest OH-divisor row tile with f32 acc <= ~96 KiB and TM % 8 == 0."""
    row_budget = max(OW, (96 * 1024) // (4 * Cout_pad))
    divisors = [d for d in range(1, OH + 1) if OH % d == 0]
    valid = [d for d in divisors if (d * OW) % 8 == 0 or d == OH]
    fit = [d for d in valid if d * OW <= row_budget]
    return max(fit) if fit else min(valid)


def _conv2d_pallas(x, w, b, stride, padding, dilation,
                   compute_dtype=jnp.bfloat16):
    """groups == 1 conv2d. x: NCHW, w: OIHW, returns NCHW in x.dtype."""
    B, Cin, H, W = x.shape
    Cout, Cin_w, KH, KW = w.shape
    assert Cin_w == Cin, "in-channel mismatch (groups != 1 not supported)"
    assert Cout >= 1, "empty (Cout == 0) weight slice is not supported"
    sh, sw = stride
    ph, pw = padding
    dh, dw = dilation
    OH = (H + 2 * ph - dh * (KH - 1) - 1) // sh + 1
    OW = (W + 2 * pw - dw * (KW - 1) - 1) // sw + 1
    Hp, Wp = H + 2 * ph, W + 2 * pw
    K = KH * KW * Cin

    # Lane-dense output / full MXU N columns: pad Cout to a multiple of 128.
    Cout_pad = -(-Cout // 128) * 128

    # Layout plumbing in the wrapper: NCHW -> NHWC, spatial zero pad, bf16 cast.
    x_pad = jnp.pad(jnp.transpose(x, (0, 2, 3, 1)),
                    ((0, 0), (ph, ph), (pw, pw), (0, 0))).astype(compute_dtype)
    # Weight OIHW -> (KH, KW, Cin, Cout) -> (K, Cout), tap-major K, padded N.
    w_k = jnp.transpose(w, (2, 3, 1, 0)).reshape(K, Cout)
    w_k = jnp.pad(w_k, ((0, 0), (0, Cout_pad - Cout))).astype(compute_dtype)
    b_vec = (jnp.zeros((Cout,), jnp.float32) if b is None
             else b.astype(jnp.float32))
    b_vec = jnp.pad(b_vec, (0, Cout_pad - Cout)).reshape(1, Cout_pad)

    TOH = _pick_row_tile(OH, OW, Cout_pad)
    MT = OH // TOH
    TM = TOH * OW

    kernel = functools.partial(
        _conv2d_kernel, KH=KH, KW=KW, sh=sh, sw=sw, dh=dh, dw=dw,
        TOH=TOH, OW=OW, Cin=Cin, Cout_pad=Cout_pad)

    # VMEM budget from the actual blocks (double-buffered) with 2x headroom,
    # clamped so it is valid on v5e/v6e (128 MiB) and v7x (64 MiB physical).
    csz = jnp.dtype(compute_dtype).itemsize
    osz = jnp.dtype(x.dtype).itemsize
    block_bytes = (Hp * Wp * Cin * csz          # input sample block
                   + K * Cout_pad * csz         # weight
                   + Cout_pad * 4               # bias
                   + TM * Cout_pad * osz)       # output tile
    needed = 2 * block_bytes + TM * K * csz + TM * Cout_pad * 4
    vmem_limit = int(min(max(2 * needed, 32 << 20), 64 << 20))
    # TODO(synk): for very large images the whole padded sample no longer fits
    # VMEM (esp. v7x's 64 MiB) -> switch the input to halo'd spatial blocks.

    cost = pl.CostEstimate(
        flops=2 * B * OH * OW * Cout_pad * K,
        transcendentals=0,
        bytes_accessed=int(x_pad.size * csz + w_k.size * csz + b_vec.size * 4
                           + B * OH * OW * Cout_pad * osz))

    out_flat = pl.pallas_call(
        kernel,
        out_shape=jax.ShapeDtypeStruct((B, OH * OW, Cout_pad), x.dtype),
        grid_spec=pltpu.PrefetchScalarGridSpec(
            num_scalar_prefetch=0,
            grid=(B, MT),
            in_specs=[
                # Full padded sample; index_map ignores mt -> DMA'd once per b.
                pl.BlockSpec((1, Hp, Wp, Cin), lambda bi, mt: (bi, 0, 0, 0)),
                # Constant weight/bias blocks: same index every step -> no
                # re-DMA.  TODO(synk): single-buffer them (pl.Buffered(1)).
                pl.BlockSpec((K, Cout_pad), lambda bi, mt: (0, 0)),
                pl.BlockSpec((1, Cout_pad), lambda bi, mt: (0, 0)),
            ],
            out_specs=pl.BlockSpec((1, TM, Cout_pad),
                                   lambda bi, mt: (bi, mt, 0)),
            scratch_shapes=[pltpu.VMEM((TM, K), compute_dtype)],
        ),
        compiler_params=pltpu.CompilerParams(
            dimension_semantics=("parallel", "parallel"),
            vmem_limit_bytes=vmem_limit,
        ),
        cost_estimate=cost,
    )(x_pad, w_k, b_vec)

    out = out_flat[:, :, :Cout].reshape(B, OH, OW, Cout)
    return jnp.transpose(out, (0, 3, 1, 2))


def dynamic_conv2d(x, weight, bias=None, stride=(1, 1), padding=(0, 0),
                   dilation=(1, 1), groups=1, c_mult_idx=None, side=None,
                   compute_dtype=jnp.bfloat16):
    """Forward pass of DynamicConv2d.

    x:      (B, C, H, W)
    weight: (out_channels, in_channels, KH, KW)
    bias:   (out_channels,) or None
    """
    assert groups == 1, "grouped conv not supported"
    # TODO(synk): grouped conv (groups > 1) has no in-kernel path here.
    B, C, H, W = x.shape
    out_channels, in_channels, KH, KW = weight.shape

    if c_mult_idx is not None:
        assert 0.0 <= c_mult_idx <= 1.0, \
            'c_mult_idx should in range [0, 1], it is {}'.format(c_mult_idx)
        out_c = int(round(c_mult_idx * out_channels))
        assert out_c >= 1, \
            'c_mult_idx={} rounds to out_c=0; empty conv unsupported'.format(c_mult_idx)
    else:
        out_c = out_channels

    if out_c != out_channels or C != in_channels:
        assert side is not None, 'need to choose which side to eval'
        if side == 'left':
            w = weight[:out_c, :C]
            b = bias[:out_c] if bias is not None else None
        elif side == 'right':
            w = weight[out_channels - out_c:, in_channels - C:]
            b = bias[out_channels - out_c:] if bias is not None else None
        else:
            raise ValueError('unknown side: {}'.format(side))
    else:
        w, b = weight, bias

    return _conv2d_pallas(x, w, b, stride, padding, dilation,
                          compute_dtype=compute_dtype)


def conv2d_reference(x, w, b, stride, padding, dilation,
                     compute_dtype=jnp.bfloat16):
    """Pure-JAX reference mirroring F.conv2d (groups=1), with the same bf16
    operand cast + f32 accumulation as the Pallas kernel."""
    out = jax.lax.conv_general_dilated(
        x.astype(compute_dtype), w.astype(compute_dtype),
        window_strides=stride,
        padding=[(padding[0], padding[0]), (padding[1], padding[1])],
        rhs_dilation=dilation,
        dimension_numbers=('NCHW', 'OIHW', 'NCHW'),
        preferred_element_type=jnp.float32).astype(x.dtype)
    if b is not None:
        out = out + b.reshape(1, -1, 1, 1).astype(x.dtype)
    return out


if __name__ == "__main__":
    key = jax.random.PRNGKey(0)
    kx, kw, kb = jax.random.split(key, 3)

    B, Cin, H, W = 2, 4, 16, 16
    Cout, KH, KW = 8, 3, 3
    stride, padding, dilation = (1, 1), (1, 1), (1, 1)

    x = jax.random.normal(kx, (B, Cin, H, W), dtype=jnp.float32)
    weight = 0.1 * jax.random.normal(kw, (Cout, Cin, KH, KW), dtype=jnp.float32)
    bias = 0.1 * jax.random.normal(kb, (Cout,), dtype=jnp.float32)

    # 1) Full-width path (c_mult_idx is None, input channels match).
    out = dynamic_conv2d(x, weight, bias, stride, padding, dilation)
    out = jax.block_until_ready(out)
    ref = conv2d_reference(x, weight, bias, stride, padding, dilation)
    assert out.shape == ref.shape and out.dtype == ref.dtype
    assert jnp.allclose(out, ref, atol=2e-3, rtol=2e-3), "full-width mismatch"

    # 2) Channel-search path: c_mult_idx=0.5, side='left' -> out_c = 4.
    out_l = dynamic_conv2d(x, weight, bias, stride, padding, dilation,
                           c_mult_idx=0.5, side='left')
    out_l = jax.block_until_ready(out_l)
    ref_l = conv2d_reference(x, weight[:4], bias[:4], stride, padding, dilation)
    assert jnp.allclose(out_l, ref_l, atol=2e-3, rtol=2e-3), "left mismatch"

    # 3) side='right' with a narrower input (C=3 != in_channels=4).
    x3 = x[:, :3]
    out_r = dynamic_conv2d(x3, weight, bias, stride, padding, dilation,
                           c_mult_idx=0.5, side='right')
    out_r = jax.block_until_ready(out_r)
    ref_r = conv2d_reference(x3, weight[Cout - 4:, Cin - 3:], bias[Cout - 4:],
                             stride, padding, dilation)
    assert jnp.allclose(out_r, ref_r, atol=2e-3, rtol=2e-3), "right mismatch"

    print("KERNEL_OK")
</pallas_src>

<mosaic_0001>
module attributes {stable_mosaic.version = 11 : i64} {
  func.func @_conv2d_kernel(%arg0: i32, %arg1: i32, %arg2: memref<1x18x18x4xbf16, #tpu.memory_space<vmem>>, %arg3: memref<36x128xbf16, #tpu.memory_space<vmem>>, %arg4: memref<1x128xf32, #tpu.memory_space<vmem>>, %arg5: memref<1x128x128xf32, #tpu.memory_space<vmem>>, %arg6: memref<128x36xbf16, #tpu.memory_space<vmem>>) attributes {dimension_semantics = [#tpu.dimension_semantics<parallel>, #tpu.dimension_semantics<parallel>], iteration_bounds = array<i64: 2, 2>, scalar_prefetch = 0 : i64, scratch_operands = 1 : i64, tpu.core_type = #tpu.core_type<tc>, window_params = [{transform_indices = @transform_0, window_bounds = array<i64: 1, 18, 18, 4>}, {pipeline_mode = #tpu.pipeline_mode<synchronous>, transform_indices = @transform_1, window_bounds = array<i64: 36, 128>}, {pipeline_mode = #tpu.pipeline_mode<synchronous>, transform_indices = @transform_2, window_bounds = array<i64: 1, 128>}, {transform_indices = @transform_3, window_bounds = array<i64: 1, 128, 128>}]} {
    %c8_i32 = arith.constant 8 : i32
    %0 = arith.muli %arg1, %c8_i32 : i32
    %1 = tpu.assume_multiple %0, 8 : i32
    %c0 = arith.constant 0 : index
    %2 = arith.index_cast %1 : i32 to index
    %c0_0 = arith.constant 0 : index
    %c0_1 = arith.constant 0 : index
    %3 = vector.load %arg2[%c0, %2, %c0_0, %c0_1] : memref<1x18x18x4xbf16, #tpu.memory_space<vmem>>, vector<1x10x18x4xbf16>
    %4 = vector.shape_cast %3 : vector<1x10x18x4xbf16> to vector<10x18x4xbf16>
    %5 = vector.extract_strided_slice %4 {offsets = [0, 0, 0], sizes = [8, 16, 4], strides = [1, 1, 1]} : vector<10x18x4xbf16> to vector<8x16x4xbf16>
    %6 = vector.shape_cast %5 : vector<8x16x4xbf16> to vector<128x4xbf16>
    %c0_2 = arith.constant 0 : index
    %c0_3 = arith.constant 0 : index
    %7 = vector.load %arg6[%c0_2, %c0_3] : memref<128x36xbf16, #tpu.memory_space<vmem>>, vector<128x4xbf16>
    tpu.vector_store %arg6[%c0_2, %c0_3], %6 {strides = array<i32>} : memref<128x36xbf16, #tpu.memory_space<vmem>>, vector<128x4xbf16>,
    %8 = vector.extract_strided_slice %4 {offsets = [0, 1, 0], sizes = [8, 16, 4], strides = [1, 1, 1]} : vector<10x18x4xbf16> to vector<8x16x4xbf16>
    %9 = vector.shape_cast %8 : vector<8x16x4xbf16> to vector<128x4xbf16>
    %c0_4 = arith.constant 0 : index
    %c4 = arith.constant 4 : index
    %10 = vector.load %arg6[%c0_4, %c4] : memref<128x36xbf16, #tpu.memory_space<vmem>>, vector<128x4xbf16>
    tpu.vector_store %arg6[%c0_4, %c4], %9 {strides = array<i32>} : memref<128x36xbf16, #tpu.memory_space<vmem>>, vector<128x4xbf16>,
    %11 = vector.extract_strided_slice %4 {offsets = [0, 2, 0], sizes = [8, 16, 4], strides = [1, 1, 1]} : vector<10x18x4xbf16> to vector<8x16x4xbf16>
    %12 = vector.shape_cast %11 : vector<8x16x4xbf16> to vector<128x4xbf16>
    %c0_5 = arith.constant 0 : index
    %c8 = arith.constant 8 : index
    %13 = vector.load %arg6[%c0_5, %c8] : memref<128x36xbf16, #tpu.memory_space<vmem>>, vector<128x4xbf16>
    tpu.vector_store %arg6[%c0_5, %c8], %12 {strides = array<i32>} : memref<128x36xbf16, #tpu.memory_space<vmem>>, vector<128x4xbf16>,
    %14 = vector.extract_strided_slice %4 {offsets = [1, 0, 0], sizes = [8, 16, 4], strides = [1, 1, 1]} : vector<10x18x4xbf16> to vector<8x16x4xbf16>
    %15 = vector.shape_cast %14 : vector<8x16x4xbf16> to vector<128x4xbf16>
    %c0_6 = arith.constant 0 : index
    %c12 = arith.constant 12 : index
    %16 = vector.load %arg6[%c0_6, %c12] : memref<128x36xbf16, #tpu.memory_space<vmem>>, vector<128x4xbf16>
    tpu.vector_store %arg6[%c0_6, %c12], %15 {strides = array<i32>} : memref<128x36xbf16, #tpu.memory_space<vmem>>, vector<128x4xbf16>,
    %17 = vector.extract_strided_slice %4 {offsets = [1, 1, 0], sizes = [8, 16, 4], strides = [1, 1, 1]} : vector<10x18x4xbf16> to vector<8x16x4xbf16>
    %18 = vector.shape_cast %17 : vector<8x16x4xbf16> to vector<128x4xbf16>
    %c0_7 = arith.constant 0 : index
    %c16 = arith.constant 16 : index
    %19 = vector.load %arg6[%c0_7, %c16] : memref<128x36xbf16, #tpu.memory_space<vmem>>, vector<128x4xbf16>
    tpu.vector_store %arg6[%c0_7, %c16], %18 {strides = array<i32>} : memref<128x36xbf16, #tpu.memory_space<vmem>>, vector<128x4xbf16>,
    %20 = vector.extract_strided_slice %4 {offsets = [1, 2, 0], sizes = [8, 16, 4], strides = [1, 1, 1]} : vector<10x18x4xbf16> to vector<8x16x4xbf16>
    %21 = vector.shape_cast %20 : vector<8x16x4xbf16> to vector<128x4xbf16>
    %c0_8 = arith.constant 0 : index
    %c20 = arith.constant 20 : index
    %22 = vector.load %arg6[%c0_8, %c20] : memref<128x36xbf16, #tpu.memory_space<vmem>>, vector<128x4xbf16>
    tpu.vector_store %arg6[%c0_8, %c20], %21 {strides = array<i32>} : memref<128x36xbf16, #tpu.memory_space<vmem>>, vector<128x4xbf16>,
    %23 = vector.extract_strided_slice %4 {offsets = [2, 0, 0], sizes = [8, 16, 4], strides = [1, 1, 1]} : vector<10x18x4xbf16> to vector<8x16x4xbf16>
    %24 = vector.shape_cast %23 : vector<8x16x4xbf16> to vector<128x4xbf16>
    %c0_9 = arith.constant 0 : index
    %c24 = arith.constant 24 : index
    %25 = vector.load %arg6[%c0_9, %c24] : memref<128x36xbf16, #tpu.memory_space<vmem>>, vector<128x4xbf16>
    tpu.vector_store %arg6[%c0_9, %c24], %24 {strides = array<i32>} : memref<128x36xbf16, #tpu.memory_space<vmem>>, vector<128x4xbf16>,
    %26 = vector.extract_strided_slice %4 {offsets = [2, 1, 0], sizes = [8, 16, 4], strides = [1, 1, 1]} : vector<10x18x4xbf16> to vector<8x16x4xbf16>
    %27 = vector.shape_cast %26 : vector<8x16x4xbf16> to vector<128x4xbf16>
    %c0_10 = arith.constant 0 : index
    %c28 = arith.constant 28 : index
    %28 = vector.load %arg6[%c0_10, %c28] : memref<128x36xbf16, #tpu.memory_space<vmem>>, vector<128x4xbf16>
    tpu.vector_store %arg6[%c0_10, %c28], %27 {strides = array<i32>} : memref<128x36xbf16, #tpu.memory_space<vmem>>, vector<128x4xbf16>,
    %29 = vector.extract_strided_slice %4 {offsets = [2, 2, 0], sizes = [8, 16, 4], strides = [1, 1, 1]} : vector<10x18x4xbf16> to vector<8x16x4xbf16>
    %30 = vector.shape_cast %29 : vector<8x16x4xbf16> to vector<128x4xbf16>
    %c0_11 = arith.constant 0 : index
    %c32 = arith.constant 32 : index
    %31 = vector.load %arg6[%c0_11, %c32] : memref<128x36xbf16, #tpu.memory_space<vmem>>, vector<128x4xbf16>
    tpu.vector_store %arg6[%c0_11, %c32], %30 {strides = array<i32>} : memref<128x36xbf16, #tpu.memory_space<vmem>>, vector<128x4xbf16>,
    %c0_12 = arith.constant 0 : index
    %c0_13 = arith.constant 0 : index
    %32 = vector.load %arg6[%c0_12, %c0_13] : memref<128x36xbf16, #tpu.memory_space<vmem>>, vector<128x36xbf16>
    %c0_14 = arith.constant 0 : index
    %c0_15 = arith.constant 0 : index
    %33 = vector.load %arg3[%c0_14, %c0_15] : memref<36x128xbf16, #tpu.memory_space<vmem>>, vector<36x128xbf16>
    %cst = arith.constant dense<0.000000e+00> : vector<128x128xf32>
    %34 = tpu.matmul %32, %33, %cst {dimension_numbers = #tpu.dot_dimension_numbers<[1], [0], [0], [1], [0, 0, 1, 1], [], []>} : vector<128x36xbf16>, vector<36x128xbf16>, vector<128x128xf32> -> vector<128x128xf32>
    %c0_16 = arith.constant 0 : index
    %c0_17 = arith.constant 0 : index
    %35 = vector.load %arg4[%c0_16, %c0_17] : memref<1x128xf32, #tpu.memory_space<vmem>>, vector<1x128xf32>
    %36 = vector.broadcast %35 : vector<1x128xf32> to vector<128x128xf32>
    %37 = arith.addf %34, %36 : vector<128x128xf32>
    %38 = vector.shape_cast %37 : vector<128x128xf32> to vector<1x128x128xf32>
    %c0_18 = arith.constant 0 : index
    %c0_19 = arith.constant 0 : index
    %c0_20 = arith.constant 0 : index
    %39 = vector.load %arg5[%c0_18, %c0_19, %c0_20] : memref<1x128x128xf32, #tpu.memory_space<vmem>>, vector<1x128x128xf32>
    tpu.vector_store %arg5[%c0_18, %c0_19, %c0_20], %38 {strides = array<i32>} : memref<1x128x128xf32, #tpu.memory_space<vmem>>, vector<1x128x128xf32>,
    return
  }
  func.func @transform_0(%arg0: i32, %arg1: i32) -> (i32, i32, i32, i32) {
    %c0_i32 = arith.constant 0 : i32
    %c0_i32_0 = arith.constant 0 : i32
    %c0_i32_1 = arith.constant 0 : i32
    %c0_i32_2 = arith.constant 0 : i32
    return %arg0, %c0_i32, %c0_i32_0, %c0_i32_1 : i32, i32, i32, i32
  }
  func.func @transform_1(%arg0: i32, %arg1: i32) -> (i32, i32) {
    %c0_i32 = arith.constant 0 : i32
    %c0_i32_0 = arith.constant 0 : i32
    %c0_i32_1 = arith.constant 0 : i32
    return %c0_i32, %c0_i32_0 : i32, i32
  }
  func.func @transform_2(%arg0: i32, %arg1: i32) -> (i32, i32) {
    %c0_i32 = arith.constant 0 : i32
    %c0_i32_0 = arith.constant 0 : i32
    %c0_i32_1 = arith.constant 0 : i32
    return %c0_i32, %c0_i32_0 : i32, i32
  }
  func.func @transform_3(%arg0: i32, %arg1: i32) -> (i32, i32, i32) {
    %c0_i32 = arith.constant 0 : i32
    %c0_i32_0 = arith.constant 0 : i32
    return %arg0, %arg1, %c0_i32 : i32, i32, i32
  }
}

</mosaic_0001>

<bundles_post_ra>
// kernel: tpu_custom_call.1
= control target key start
LH: loop header
LB: loop body
LE: loop exit
PB: predicated region body
PF: predicated region fallthrough
CT: control target
= control target key end

     0   :  { %8 = vsyncpa [#allocation4], 0  ;;  %s2601_s0 = inlined_call_operand.vmem [shape: bf16[2,18,18,4], index: 0, kind: input, shape index: {}]   ;;  %s2602_s1 = inlined_call_operand.vmem [shape: bf16[36,128], index: 1, kind: input, shape index: {}]   ;;  %s2603_s2 = inlined_call_operand.vmem [shape: f32[1,128], index: 2, kind: input, shape index: {}]   ;;  %s2604_s3 = inlined_call_operand.hbm [shape: f32[2,256,128], index: 3, kind: output, shape index: {}]  }
   0x1   :  { %10 = vsyncpa [#allocation4 + $0x1], 0  ;;  %s1725_s12 = smov 0   ;;  %s1727_s13 = smov 0  }
   0x2   :  { %s1729_s14 = smov 0   ;;  %s1731_s15 = smov 0  }
   0x3   :  { %s1733_s16 = smov 0   ;;  %s1735_s17 = smov 0  }
   0x4   :  { %s1737_s18 = smov 0   ;;  %s1739_s19 = smov 0  }
   0x5 LB: > { %s1421_s20 = sadd.s32 4294967295, %s1693_s19   ;;  %s1422_s21 = sadd.s32 4294967294, %s1693_s19   ;;  %s1693_s19 = sphi %s1739_s19, %s16_s19   ;;  %s1689_s18 = sphi %s1737_s18, %s2617_s18   ;;  %s1685_s17 = sphi %s1735_s17, %s2616_s17   ;;  %s1681_s16 = sphi %s1733_s16, %s2615_s16   ;;  %s1677_s15 = sphi %s1731_s15, %s2614_s15   ;;  %s1673_s14 = sphi %s1729_s14, %s2613_s14   ;;  %s1669_s13 = sphi %s1727_s13, %s2612_s13   ;;  %s1665_s12 = sphi %s1725_s12, %s2611_s12  }
   0x6   : > { %s25_s22 = sadd.s32 1, %s1685_s17  ;;  %s28_s23 = sadd.s32 1, %s1689_s18 }
   0x7   : > { %p26_p0 = scmp.ge.s32.totalorder %s25_s22, 2  ;;  %p115_p1 = scmp.ne.s32.totalorder %s1673_s14, %s1669_s13 }
   0x8   : > { %p116_p2 = scmp.eq.s32.totalorder %s1421_s20, 3  ;;  %p121_p5 = scmp.ne.s32.totalorder %s1669_s13, %s1665_s12 }
   0x9   : > { %s2619_s22 = smov (%p26_p0, %s25_s22), 0  ;;  %s2621_s23 = smov (!%p26_p0, %s28_s23), %s1689_s18 }
   0xa   : > { %s101_s24 = ssub.s32 %s1685_s17, %s2619_s22  ;;  %p1776_p3 = por %p116_p2, %p115_p1 }
   0xb   : > { %p30_p4 = scmp.ge.s32.totalorder %s2621_s23, 2  ;;  %p122_p6 = scmp.eq.s32.totalorder %s1422_s21, 3 }
   0xc   : > { %p1425_p7 = scmp.ge.s32.totalorder %s1693_s19, 1  ;;  %p154_p9 = scmp.lt.s32.totalorder %s1693_s19, 5 }
   0xd   : > { %s2623_s23 = smov (%p30_p4, %s2621_s23), 0  ;;  %p1785_p8 = por %p122_p6, %p121_p5 }
   0xe   : > { %s100_s27 = ssub.s32 %s1689_s18, %s2623_s23  ;;  %s105_s28 = sadd.s32 1, %s1673_s14 }
   0xf   : > { %s102_s29 = sor.u32 %s101_s24, %s100_s27  ;;  %p155_p10 = pnand %p1425_p7, %p154_p9 }
  0x10   : > { %p103_p11 = scmp.eq.s32.totalorder %s102_s29, 0  ;;  %p178_p12 = scmp.lt.s32.totalorder (!%p155_p10), %s1681_s16, 1 }
  0x11   : > { %158 = sbr.rel (%p155_p10) target bundleno = 630 (0x276), region = 32  ;;  %s1695_s11 = smov (!%p155_p10), 8  }
  0x12   : > { %s1794_s30 = scalar_select %p103_p11, %s1673_s14, %s105_s28  }
  0x13   : > { %s1467_s5 = smul.u32 (!%p155_p10), 96, %s1677_s15  ;;  %s1696_s20 = smov (!%p155_p10), 4  }
  0x14   : > { %s1697_s21 = smov (!%p155_p10), 12   ;;  %s1698_s24 = smov (!%p155_p10), 16  }
  0x15   : > { %s1699_s27 = smov (!%p155_p10), 20   ;;  %s1700_s28 = smov (!%p155_p10), 24  }
  0x16   : > { %s179_s4 = scalar_select %p178_p12, %s1681_s16, 1  ;;  %vm520_vm0 = vcmask 1042432   ;;  %vm521_vm1 = vcmask 1046532   ;;  %vm219_vm2 = vcmask 27648   ;;  %vm236_vm4 = vsmask.f32 3328 }
  0x17   : > { %vm1804_vm3 = vmor %vm520_vm0, %vm521_vm1  ;;  %vm237_vm5 = vsmask.f32 7440  ;;  %s1701_s29 = smov 28   ;;  %vm1210_vm7 = vcmask 1041408   ;;  %vm479_vm8 = vcmask 60448   ;;  %vm627_vm9 = vcmask 93248  }
  0x18   : > { %s1509_s6 = smul.u32 216, %s179_s4  ;;  %vm1853_vm6 = vmor %vm236_vm4, %vm237_vm5  ;;  %vm694_vm10 = vcmask 126048   ;;  %vm783_vm11 = vcmask 158848   ;;  %vm856_vm12 = vcmask 191648   ;;  %vm923_vm13 = vcmask 224448  }
  0x19   : > { %vm1012_vm14 = vcmask 257248   ;;  %vm1085_vm15 = vcmask 290048   ;;  %vm1185_vm0 = vcmask 293888  }
  0x1a   : > { %s182_s9 = scalar_lea.vmem %s2601_s0, %s1509_s6  ;;  %s1702_s6 = smov 32  }
  0x1b   : > { %s1802_s10 = scalar_lea.vmem %s182_s9, %s1467_s5 }
  0x1c   : > { %v190_v1 = vld [vmem:[%s1802_s10 + $0x4] sm:$0xf]  ;;  %v191_v2 = vld [vmem:[%s1802_s10 + $0x8] sm:$0x1]  ;;  %v189_v3 = vld [vmem:[%s1802_s10] sm:$0xf] }
  0x1d   : > { %v525_v4 = vrot.slane %v190_v1, 5  ;;  %v528_v5 = vrot.slane %v191_v2, 5  ;;  %v1431_v6 = vrot.slane %v189_v3, 9  ;;  %v1812_v7 = vld [vmem:[%s1802_s10 + $0x30] sm:$0xf]  ;;  %v240_v8 = vshrl.u32 %v189_v3, 16 }
  0x1e   : > { %220 = vst.msk [vmem:[#allocation2] sm:$0xf] %vm219_vm2, %v189_v3  ;;  %221 = vst.msk [vmem:[#allocation2 + $0x4] sm:$0xf] %vm219_vm2, %v190_v1  ;;  %v1817_v9 = vld [vmem:[%s1802_s10 + $0x34] sm:$0xf] }
  0x1f   : > { %v336_v10 = vshrl.u32 %v1812_v7, 16  ;;  %v339_v11 = vshll.u32 %v1812_v7, 16  ;;  %v243_v12 = vshll.u32 %v189_v3, 16  ;;  %v249_v13 = vshll.u32 %v190_v1, 16  ;;  %228 = vst.msk [vmem:[#allocation2 + $0x20] sm:$0xf] %vm219_vm2, %v1812_v7 }
  0x20   : > { %v527_v14 = vrot.slane %v525_v4, 4  ;;  %v526_v15 = vsel %vm1804_vm3, %v1431_v6, %v525_v4  ;;  %v345_v16 = vshll.u32 %v1817_v9, 16  ;;  %v242_v17 = vrot.slane %v240_v8, 4  ;;  %v1827_v18 = vld [vmem:[%s1802_s10 + $0x38] sm:$0x1] }
  0x21   : > { %229 = vst.msk [vmem:[#allocation2 + $0x24] sm:$0xf] %vm219_vm2, %v1817_v9  ;;  %579 = vrot.lane.b32.xlu0 %v526_v15, %s1695_s11  ;;  %v338_v19 = vrot.slane %v336_v10, 4  ;;  %v341_v20 = vrot.slane %v339_v11, 5  ;;  %v245_v21 = vrot.slane %v243_v12, 5  ;;  %v251_v22 = vrot.slane %v249_v13, 5 }
  0x22   : > { %v1833_v23 = vld [vmem:[%s1802_s10 + $0x10] sm:$0xf]  ;;  %v529_v24 = vsel %vm1804_vm3, %v527_v14, %v528_v5  ;;  %v347_v25 = vrot.slane %v345_v16, 5  ;;  %v349_v26 = vshrl.u32 %v1817_v9, 16  ;;  %v355_v27 = vshll.u32 %v1827_v18, 16 }
  0x23   : > { %v1840_v28 = vld [vmem:[%s1802_s10 + $0x14] sm:$0x1]  ;;  %223 = vst.msk [vmem:[#allocation2 + $0xc] sm:$0xf] %vm219_vm2, %v1833_v23  ;;  %581 = vrot.lane.b32.xlu1 %v529_v24, %s1695_s11  ;;  %v342_v29 = vor.u32 %v341_v20, %v338_v19  ;;  %v246_v30 = vor.u32 %v245_v21, %v242_v17  ;;  %v253_v31 = vshrl.u32 %v190_v1, 16  ;;  %v259_v32 = vshll.u32 %v191_v2, 16 }
  0x24   : > { %v1846_v33 = vld [vmem:[%s1802_s10 + $0xc] sm:$0xf]  ;;  %v1849_v34 = vld [vmem:[%s1802_s10 + $0x40] sm:$0xf]  ;;  %v351_v36 = vrot.slane %v349_v26, 4  ;;  %v357_v37 = vrot.slane %v355_v27, 5 }
  0x25   : > { %v273_v38 = vshll.u32 %v1833_v23, 16  ;;  %v277_v39 = vshrl.u32 %v1833_v23, 16  ;;  %222 = vst.msk [vmem:[#allocation2 + $0x8] sm:$0xf] %vm219_vm2, %v1846_v33  ;;  %231 = vst.msk [vmem:[#allocation2 + $0x2c] sm:$0xf] %vm219_vm2, %v1849_v34 }
  0x26   : > { %v343_v40 = vrot.slane %v342_v29, 4  ;;  %v247_v41 = vrot.slane %v246_v30, 4  ;;  %v255_v42 = vrot.slane %v253_v31, 4  ;;  %v261_v43 = vrot.slane %v259_v32, 5  ;;  %v1864_v44 = vld [vmem:[%s1802_s10 + $0x44] sm:$0x1] }
  0x27   : > { %v1867_v45 = vld [vmem:[%s1802_s10 + $0x3c] sm:$0xf]  ;;  %v352_v46 = vor.u32 %v351_v36, %v347_v25  ;;  %v275_v47 = vrot.slane %v273_v38, 5  ;;  %v279_v48 = vrot.slane %v277_v39, 4  ;;  %v283_v49 = vshll.u32 %v1840_v28, 16 }
  0x28   : > { %v1871_v50 = vld [vmem:[%s1802_s10 + $0x1c] sm:$0xf]  ;;  %230 = vst.msk [vmem:[#allocation2 + $0x28] sm:$0xf] %vm219_vm2, %v1867_v45  ;;  %v1877_v51 = vsel %vm1853_vm6, %v343_v40, %v347_v25  ;;  %v252_v52 = vsel %vm1853_vm6, %v247_v41, %v251_v22  ;;  %v256_v53 = vor.u32 %v255_v42, %v251_v22  ;;  %v264_v54 = vshrl.u32 %v1846_v33, 16 }
  0x29   : > { %v1883_v55 = vld [vmem:[%s1802_s10 + $0x18] sm:$0xf]  ;;  %v1886_v56 = vld [vmem:[%s1802_s10 + $0x4c] sm:$0xf]  ;;  %225 = vst.msk [vmem:[#allocation2 + $0x14] sm:$0xf] %vm219_vm2, %v1871_v50  ;;  %447 = vrot.lane.b32.xlu1 %v1877_v51, %s1696_s20  ;;  %431 = vrot.lane.b32.xlu0 %v252_v52, %s1696_s20  ;;  %v280_v58 = vor.u32 %v279_v48, %v275_v47 }
  0x2a   : > { %v353_v57 = vrot.slane %v352_v46, 4  ;;  %v285_v59 = vrot.slane %v283_v49, 5  ;;  %v267_v60 = vshll.u32 %v1846_v33, 16  ;;  %v1895_v61 = vld [vmem:[%s1802_s10 + $0x48] sm:$0xf]  ;;  %v257_v62 = vrot.slane %v256_v53, 4 }
  0x2b   : > { %224 = vst.msk [vmem:[#allocation2 + $0x10] sm:$0xf] %vm219_vm2, %v1883_v55  ;;  %233 = vst.msk [vmem:[#allocation2 + $0x34] sm:$0xf] %vm219_vm2, %v1886_v56  ;;  %v266_v63 = vrot.slane %v264_v54, 4  ;;  %v369_v1 = vshll.u32 %v1849_v34, 16 }
  0x2c   : > { %v373_v2 = vshrl.u32 %v1849_v34, 16  ;;  %232 = vst.msk [vmem:[#allocation2 + $0x30] sm:$0xf] %vm219_vm2, %v1895_v61  ;;  %v1907_v3 = vsel %vm1853_vm6, %v353_v57, %v357_v37  ;;  %v281_v4 = vrot.slane %v280_v58, 4  ;;  %v269_v5 = vrot.slane %v267_v60, 5 }
  0x2d   : > { %v379_v6 = vshll.u32 %v1864_v44, 16  ;;  %v262_v8 = vsel %vm1853_vm6, %v257_v62, %v261_v43  ;;  %v371_v10 = vrot.slane %v369_v1, 5  ;;  %v360_v12 = vshrl.u32 %v1867_v45, 16  ;;  %v1914_v13 = vld [vmem:[%s1802_s10 + $0x28] sm:$0xf]  ;;  %449 = vrot.lane.b32.xlu1 %v1907_v3, %s1696_s20 }
  0x2e   : > { %v375_v11 = vrot.slane %v373_v2, 4  ;;  %433 = vrot.lane.b32.xlu0 %v262_v8, %s1696_s20  ;;  %v1921_v14 = vsel %vm1853_vm6, %v281_v4, %v285_v59  ;;  %v270_v15 = vor.u32 %v269_v5, %v266_v63  ;;  %v363_v16 = vshll.u32 %v1867_v45, 16  ;;  %v1925_v17 = vld [vmem:[%s1802_s10 + $0x24] sm:$0xf]  ;;  %v1928_v19 = vld [vmem:[%s1802_s10 + $0x58] sm:$0xf] }
  0x2f   : > { %227 = vst.msk [vmem:[#allocation2 + $0x1c] sm:$0xf] %vm219_vm2, %v1914_v13  ;;  %v381_v21 = vrot.slane %v379_v6, 5  ;;  %v362_v22 = vrot.slane %v360_v12, 4  ;;  %v553_v24 = vrot.slane %v1817_v9, 5  ;;  %v556_v37 = vrot.slane %v1827_v18, 5 }
  0x30   : > { %v376_v20 = vor.u32 %v375_v11, %v371_v10  ;;  %v1934_v25 = vld [vmem:[%s1802_s10 + $0x54] sm:$0xf]  ;;  %226 = vst.msk [vmem:[#allocation2 + $0x18] sm:$0xf] %vm219_vm2, %v1925_v17  ;;  %235 = vst.msk [vmem:[#allocation2 + $0x3c] sm:$0xf] %vm219_vm2, %v1928_v19 }
  0x31   : > { %v271_v26 = vrot.slane %v270_v15, 4  ;;  %v365_v27 = vrot.slane %v363_v16, 5  ;;  %234 = vst.msk [vmem:[#allocation2 + $0x38] sm:$0xf] %vm219_vm2, %v1934_v25  ;;  %437 = vrot.lane.b32.xlu1 %v1921_v14, %s1696_s20  ;;  %v555_v36 = vrot.slane %v553_v24, 4  ;;  %v532_v38 = vrot.slane %v1833_v23, 5 }
  0x32   : > { %v377_v29 = vrot.slane %v376_v20, 4  ;;  %v1435_v40 = vrot.slane %v1812_v7, 9  ;;  %v535_v43 = vrot.slane %v1840_v28, 5  ;;  %v560_v46 = vrot.slane %v1849_v34, 5  ;;  %v197_v2 = vld [vmem:[%s1802_s10 + $0x20] sm:$0x1] }
  0x33   : > { %v276_v30 = vsel %vm1853_vm6, %v271_v26, %v275_v47  ;;  %v366_v31 = vor.u32 %v365_v27, %v362_v22  ;;  %v1964_v42 = vsel %vm1804_vm3, %v555_v36, %v556_v37  ;;  %v534_v18 = vrot.slane %v532_v38, 4  ;;  %v209_v20 = vld [vmem:[%s1802_s10 + $0x50] sm:$0x1] }
  0x34   : > { %435 = vrot.lane.b32.xlu0 %v276_v30, %s1696_s20  ;;  %v1949_v32 = vsel %vm1853_vm6, %v377_v29, %v381_v21  ;;  %v1970_v47 = vsel %vm1804_vm3, %v1435_v40, %v553_v24  ;;  %v1432_v48 = vrot.slane %v1846_v33, 9  ;;  %v562_v52 = vrot.slane %v560_v46, 4 }
  0x35   : > { %v367_v39 = vrot.slane %v366_v31, 4  ;;  %453 = vrot.lane.b32.xlu1 %v1949_v32, %s1696_s20  ;;  %v1979_v49 = vsel %vm1804_vm3, %v534_v18, %v535_v43  ;;  %v563_v28 = vrot.slane %v1864_v44, 5  ;;  %v1436_v54 = vrot.slane %v1867_v45, 9 }
  0x36   : > { %v533_v53 = vsel %vm1804_vm3, %v1432_v48, %v532_v38  ;;  %v297_v44 = vshll.u32 %v1871_v50, 16  ;;  %v301_v59 = vshrl.u32 %v1871_v50, 16  ;;  %v288_v60 = vshrl.u32 %v1883_v55, 16 }
  0x37   : > { %v1958_v41 = vsel %vm1853_vm6, %v367_v39, %v371_v10  ;;  %v1990_v57 = vsel %vm1804_vm3, %v562_v52, %v563_v28  ;;  %v1994_v58 = vsel %vm1804_vm3, %v1436_v54, %v560_v46  ;;  %v291_v62 = vshll.u32 %v1883_v55, 16 }
  0x38   : > { %451 = vrot.lane.b32.xlu0 %v1958_v41, %s1696_s20  ;;  %v393_v63 = vshll.u32 %v1886_v56, 16  ;;  %v397_v1 = vshrl.u32 %v1886_v56, 16  ;;  %v290_v4 = vrot.slane %v288_v60, 4  ;;  %v384_v6 = vshrl.u32 %v1895_v61, 16 }
  0x39   : > { %597 = vrot.lane.b32.xlu1 %v1964_v42, %s1695_s11  ;;  %v293_v5 = vrot.slane %v291_v62, 5  ;;  %v387_v8 = vshll.u32 %v1895_v61, 16  ;;  %v307_v11 = vshll.u32 %v197_v2, 16  ;;  %v403_v29 = vshll.u32 %v209_v20, 16 }
  0x3a   : > { %v395_v12 = vrot.slane %v393_v63, 5  ;;  %v399_v15 = vrot.slane %v397_v1, 4  ;;  %v386_v21 = vrot.slane %v384_v6, 4  ;;  %v539_v43 = vrot.slane %v1871_v50, 5 }
  0x3b   : > { %v294_v16 = vor.u32 %v293_v5, %v290_v4  ;;  %v389_v22 = vrot.slane %v387_v8, 5  ;;  %v309_v26 = vrot.slane %v307_v11, 5  ;;  %v542_v48 = vrot.slane %v197_v2, 5  ;;  %v2111_v2 = vld [vmem:[%s1802_s10 + $0x2c] sm:$0x1] }
  0x3c   : > { %595 = vrot.lane.b32.xlu0 %v1970_v47, %s1695_s11  ;;  %v400_v27 = vor.u32 %v399_v15, %v395_v12  ;;  %v541_v46 = vrot.slane %v539_v43, 4  ;;  %v567_v52 = vrot.slane %v1886_v56, 5  ;;  %v1433_v28 = vrot.slane %v1883_v55, 9 }
  0x3d   : > { %585 = vrot.lane.b32.xlu1 %v1979_v49, %s1695_s11  ;;  %v295_v31 = vrot.slane %v294_v16, 4  ;;  %v390_v36 = vor.u32 %v389_v22, %v386_v21  ;;  %v312_v63 = vshrl.u32 %v1925_v17, 16  ;;  %v315_v1 = vshll.u32 %v1925_v17, 16 }
  0x3e   : > { %v401_v38 = vrot.slane %v400_v27, 4  ;;  %v2069_v54 = vsel %vm1804_vm3, %v541_v46, %v542_v48  ;;  %v408_v6 = vshrl.u32 %v1934_v25, 16  ;;  %v411_v8 = vshll.u32 %v1934_v25, 16 }
  0x3f   : > { %v391_v39 = vrot.slane %v390_v36, 4  ;;  %v314_v4 = vrot.slane %v312_v63, 4  ;;  %v317_v5 = vrot.slane %v315_v1, 5  ;;  %v331_v11 = vshll.u32 %v2111_v2, 16 }
  0x40   : > { %583 = vrot.lane.b32.xlu0 %v533_v53, %s1695_s11  ;;  %v410_v21 = vrot.slane %v408_v6, 4  ;;  %v413_v22 = vrot.slane %v411_v8, 5  ;;  %v1434_v6 = vrot.slane %v1925_v17, 9 }
  0x41   : > { %601 = vrot.lane.b32.xlu1 %v1990_v57, %s1695_s11  ;;  %v2051_v18 = vsel %vm1853_vm6, %v391_v39, %v395_v12  ;;  %v318_v16 = vor.u32 %v317_v5, %v314_v4 }
  0x42   : > { %v414_v36 = vor.u32 %v413_v22, %v410_v21 }
  0x44   : > { %599 = vrot.lane.b32.xlu0 %v1994_v58, %s1695_s11  ;;  %v415_v46 = vrot.slane %v414_v36, 4 }
  0x45   : > { %648 = vrot.lane.b32.xlu1 %v1833_v23, %s1697_s21  ;;  %v299_v23 = vrot.slane %v297_v44, 5  ;;  %v569_v44 = vrot.slane %v567_v52, 4 }
  0x48   : > { %646 = vrot.lane.b32.xlu0 %v1846_v33, %s1697_s21  ;;  %v303_v33 = vrot.slane %v301_v59, 4  ;;  %v1437_v59 = vrot.slane %v1895_v61, 9 }
  0x49   : > { %664 = vrot.lane.b32.xlu1 %v1849_v34, %s1697_s21 }
  0x4a   : > { %v304_v10 = vor.u32 %v303_v33, %v299_v23  ;;  %v2086_v62 = vsel %vm1804_vm3, %v1437_v59, %v567_v52  ;;  %v325_v33 = vshrl.u32 %v1914_v13, 16 }
  0x4c   : > { %662 = vrot.lane.b32.xlu0 %v1867_v45, %s1697_s21  ;;  %v305_v24 = vrot.slane %v304_v10, 4 }
  0x4d   : > { %652 = vrot.lane.b32.xlu1 %v1871_v50, %s1697_s21 }
  0x4e   : > { %v2035_v37 = vsel %vm1853_vm6, %v305_v24, %v309_v26  ;;  %v333_v26 = vrot.slane %v331_v11, 5  ;;  %v1438_v11 = vrot.slane %v1934_v25, 9 }
  0x50   : > { %650 = vrot.lane.b32.xlu0 %v1883_v55, %s1697_s21 }
  0x51   : > { %668 = vrot.lane.b32.xlu1 %v1886_v56, %s1697_s21 }
  0x54   : > { %666 = vrot.lane.b32.xlu0 %v1895_v61, %s1697_s21 }
  0x55   : > { %737 = vrot.lane.b32.xlu1 %v1921_v14, %s1698_s24  ;;  %v405_v14 = vrot.slane %v403_v29, 5 }
  0x57   : > { %v2047_v40 = vsel %vm1853_vm6, %v401_v38, %v405_v14 }
  0x58   : > { %735 = vrot.lane.b32.xlu0 %v276_v30, %s1698_s24  ;;  %v2039_v30 = vsel %vm1853_vm6, %v295_v31, %v299_v23  ;;  %v321_v23 = vshll.u32 %v1914_v13, 16  ;;  %v319_v31 = vrot.slane %v318_v16, 4 }
  0x59   : > { %753 = vrot.lane.b32.xlu1 %v1949_v32, %s1698_s24 }
  0x5c   : > { %751 = vrot.lane.b32.xlu0 %v1958_v41, %s1698_s24 }
  0x5d   : > { %741 = vrot.lane.b32.xlu1 %v2035_v37, %s1698_s24 }
  0x60   : > { %739 = vrot.lane.b32.xlu0 %v2039_v30, %s1698_s24 }
  0x61   : > { %757 = vrot.lane.b32.xlu1 %v2047_v40, %s1698_s24 }
  0x64   : > { %755 = vrot.lane.b32.xlu0 %v2051_v18, %s1698_s24 }
  0x65   : > { %810 = vrot.lane.b32.xlu1 %v1979_v49, %s1699_s27  ;;  %v570_v49 = vrot.slane %v209_v20, 5  ;;  %v2121_v20 = vld [vmem:[%s1802_s10 + $0x5c] sm:$0x1] }
  0x66   : > { %v427_v29 = vshll.u32 %v2121_v20, 16 }
  0x67   : > { %v2082_v60 = vsel %vm1804_vm3, %v569_v44, %v570_v49 }
  0x68   : > { %808 = vrot.lane.b32.xlu0 %v533_v53, %s1699_s27  ;;  %v2073_v53 = vsel %vm1804_vm3, %v1433_v28, %v539_v43  ;;  %v429_v39 = vrot.slane %v427_v29, 5  ;;  %v1591_v28 = vld [vmem:[%s2602_s1 + $0x10] ss:$0 sps:$4 sm:$0x33]  }
  0x69   : > { %826 = vrot.lane.b32.xlu1 %v1990_v57, %s1699_s27  ;;  %1507 = vmatprep.subr.msk.bf16.mxu0 %vm1210_vm7, %v1591_v28  ;;  %v1212_v59 = vsel %vm1210_vm7, %v1591_v28, 0 }
  0x6a   : > { %1480 = vmatpush3.bf16.msra.mxu0 %v1212_v59  ;;  %1508 = vmatprep.subr.msk.bf16.mxu1 %vm1210_vm7, %v1591_v28 }
  0x6b   : > { %1504 = vmatpush3.bf16.msra.mxu1 %v1212_v59 }
  0x6c   : > { %824 = vrot.lane.b32.xlu0 %v1994_v58, %s1699_s27 }
  0x6d   : > { %814 = vrot.lane.b32.xlu1 %v2069_v54, %s1699_s27 }
  0x70   : > { %812 = vrot.lane.b32.xlu0 %v2073_v53, %s1699_s27 }
  0x71   : > { %830 = vrot.lane.b32.xlu1 %v2082_v60, %s1699_s27 }
  0x74   : > { %828 = vrot.lane.b32.xlu0 %v2086_v62, %s1699_s27 }
  0x75   : > { %877 = vrot.lane.b32.xlu1 %v1871_v50, %s1700_s28  ;;  %v323_v50 = vrot.slane %v321_v23, 5  ;;  %v1593_v23 = vld [vmem:[%s2602_s1 + $0x8] sm:$0xff]  }
  0x76   : > { %1481 = vmatprep.subr.bf16.mxu0 %v1593_v23  ;;  %1502 = vmatprep.subr.bf16.mxu1 %v1593_v23 }
  0x77   : > { %v2138_v43 = vsel %vm1853_vm6, %v319_v31, %v323_v50  ;;  %1482 = vmatpush3.bf16.msra.mxu0 %v1593_v23  ;;  %1505 = vmatpush3.bf16.msra.mxu1 %v1593_v23 }
  0x78   : > { %875 = vrot.lane.b32.xlu0 %v1883_v55, %s1700_s28  ;;  %v327_v55 = vrot.slane %v325_v33, 4  ;;  %v546_v33 = vrot.slane %v1914_v13, 5 }
  0x79   : > { %893 = vrot.lane.b32.xlu1 %v1886_v56, %s1700_s28  ;;  %v417_v56 = vshll.u32 %v1928_v19, 16 }
  0x7a   : > { %v328_v10 = vor.u32 %v327_v55, %v323_v50  ;;  %v1594_v50 = vld [vmem:[%s2602_s1] sm:$0xff]   ;;  %v548_v55 = vrot.slane %v546_v33, 4 }
  0x7b   : > { %v419_v12 = vrot.slane %v417_v56, 5  ;;  %v549_v56 = vrot.slane %v2111_v2, 5  ;;  %1483 = vmatprep.subr.bf16.mxu0 %v1594_v50  ;;  %1503 = vmatprep.subr.bf16.mxu1 %v1594_v50  ;;  %v577_v2 = vrot.slane %v2121_v20, 5 }
  0x7c   : > { %891 = vrot.lane.b32.xlu0 %v1895_v61, %s1700_s28  ;;  %v421_v61 = vshrl.u32 %v1928_v19, 16  ;;  %v329_v24 = vrot.slane %v328_v10, 4  ;;  %1484 = vmatpush3.bf16.msra.mxu0 %v1594_v50  ;;  %v2198_v10 = vsel %vm1804_vm3, %v1434_v6, %v546_v33 }
  0x7d   : > { %881 = vrot.lane.b32.xlu1 %v1914_v13, %s1700_s28  ;;  %v2150_v52 = vsel %vm1853_vm6, %v415_v46, %v419_v12  ;;  %1506 = vmatpush3.bf16.msra.mxu1 %v1594_v50 }
  0x7e   : > { %v423_v15 = vrot.slane %v421_v61, 4  ;;  %v2134_v38 = vsel %vm1853_vm6, %v329_v24, %v333_v26  ;;  %v574_v61 = vrot.slane %v1928_v19, 5 }
  0x80   : > { %879 = vrot.lane.b32.xlu0 %v1925_v17, %s1700_s28  ;;  %v424_v27 = vor.u32 %v423_v15, %v419_v12  ;;  %v2213_v15 = vsel %vm1804_vm3, %v1438_v11, %v574_v61 }
  0x81   : > { %897 = vrot.lane.b32.xlu1 %v1928_v19, %s1700_s28 }
  0x82   : > { %v425_v14 = vrot.slane %v424_v27, 4 }
  0x84   : > { %895 = vrot.lane.b32.xlu0 %v1934_v25, %s1700_s28  ;;  %v2146_v48 = vsel %vm1853_vm6, %v425_v14, %v429_v39 }
  0x85   : > { %966 = vrot.lane.b32.xlu1 %v2035_v37, %s1701_s29 }
  0x88   : > { %964 = vrot.lane.b32.xlu0 %v2039_v30, %s1701_s29 }
  0x89   : > { %982 = vrot.lane.b32.xlu1 %v2047_v40, %s1701_s29 }
  0x8c   : > { %980 = vrot.lane.b32.xlu0 %v2051_v18, %s1701_s29 }
  0x8d   : > { %970 = vrot.lane.b32.xlu1 %v2134_v38, %s1701_s29 }
  0x90   : > { %968 = vrot.lane.b32.xlu0 %v2138_v43, %s1701_s29 }
  0x91   : > { %986 = vrot.lane.b32.xlu1 %v2146_v48, %s1701_s29 }
  0x93   : > { %v580_v44 = vpop.permute.xlu0 %579 }
  0x94   : > { %984 = vrot.lane.b32.xlu0 %v2150_v52, %s1701_s29 }
  0x95   : > { %1039 = vrot.lane.b32.xlu1 %v2069_v54, %s1702_s6  ;;  %v582_v49 = vpop.permute.xlu1 %581 }
  0x98   : > { %1037 = vrot.lane.b32.xlu0 %v2073_v53, %s1702_s6 }
  0x99   : > { %1055 = vrot.lane.b32.xlu1 %v2082_v60, %s1702_s6 }
  0x9b   : > { %v448_v63 = vpop.permute.xlu1 %447  ;;  %v432_v1 = vpop.permute.xlu0 %431 }
  0x9c   : > { %1053 = vrot.lane.b32.xlu0 %v2086_v62, %s1702_s6  ;;  %488 = vst.msk [vmem:[#allocation2 + $0x20] sm:$0xf] %vm479_vm8, %v448_v63  ;;  %480 = vst.msk [vmem:[#allocation2] sm:$0xf] %vm479_vm8, %v432_v1 }
  0x9d   : > { %441 = vrot.lane.b32.xlu1 %v2035_v37, %s1696_s20  ;;  %628 = vst.msk [vmem:[#allocation2] sm:$0xf] %vm627_vm9, %v580_v44  ;;  %v2193_v37 = vsel %vm1804_vm3, %v548_v55, %v549_v56  ;;  %v2279_v44 = vld [vmem:[%s1802_s10 + $0x60] sm:$0xf]  ;;  %v215_v55 = vld [vmem:[%s1802_s10 + $0x68] sm:$0x1] }
  0x9e   : > { %v712_v59 = vshrl.u32 %v2279_v44, 16  ;;  %v715_v23 = vshll.u32 %v2279_v44, 16  ;;  %v731_v6 = vshll.u32 %v215_v55, 16 }
  0x9f   : > { %v450_v4 = vpop.permute.xlu1 %449 }
  0xa0   : > { %439 = vrot.lane.b32.xlu0 %v2039_v30, %s1696_s20  ;;  %v434_v5 = vpop.permute.xlu0 %433  ;;  %489 = vst.msk [vmem:[#allocation2 + $0x24] sm:$0xf] %vm479_vm8, %v450_v4  ;;  %v576_v30 = vrot.slane %v574_v61, 4  ;;  %v714_v56 = vrot.slane %v712_v59, 4  ;;  %v717_v61 = vrot.slane %v715_v23, 5  ;;  %v733_v11 = vrot.slane %v731_v6, 5 }
  0xa1   : > { %481 = vst.msk [vmem:[#allocation2 + $0x4] sm:$0xf] %vm479_vm8, %v434_v5  ;;  %457 = vrot.lane.b32.xlu1 %v2047_v40, %s1696_s20 }
  0xa2   : > { %629 = vst.msk [vmem:[#allocation2 + $0x4] sm:$0xf] %vm627_vm9, %v582_v49 }
  0xa3   : > { %v438_v8 = vpop.permute.xlu1 %437 }
  0xa4   : > { %455 = vrot.lane.b32.xlu0 %v2051_v18, %s1696_s20  ;;  %483 = vst.msk [vmem:[#allocation2 + $0xc] sm:$0xf] %vm479_vm8, %v438_v8  ;;  %v2209_v18 = vsel %vm1804_vm3, %v576_v30, %v577_v2  ;;  %v718_v2 = vor.u32 %v717_v61, %v714_v56 }
  0xa5   : > { %1043 = vrot.lane.b32.xlu1 %v2193_v37, %s1702_s6 }
  0xa6   : > { %v436_v40 = vpop.permute.xlu0 %435 }
  0xa7   : > { %482 = vst.msk [vmem:[#allocation2 + $0x8] sm:$0xf] %vm479_vm8, %v436_v40  ;;  %v454_v12 = vpop.permute.xlu1 %453 }
  0xa8   : > { %1041 = vrot.lane.b32.xlu0 %v2198_v10, %s1702_s6  ;;  %491 = vst.msk [vmem:[#allocation2 + $0x2c] sm:$0xf] %vm479_vm8, %v454_v12  ;;  %v719_v12 = vrot.slane %v718_v2, 4 }
  0xa9   : > { %1059 = vrot.lane.b32.xlu1 %v2209_v18, %s1702_s6 }
  0xaa   : > { %v452_v16 = vpop.permute.xlu0 %451 }
  0xab   : > { %490 = vst.msk [vmem:[#allocation2 + $0x28] sm:$0xf] %vm479_vm8, %v452_v16  ;;  %v598_v20 = vpop.permute.xlu1 %597 }
  0xac   : > { %1057 = vrot.lane.b32.xlu0 %v2213_v15, %s1702_s6  ;;  %637 = vst.msk [vmem:[#allocation2 + $0x24] sm:$0xf] %vm627_vm9, %v598_v20 }
  0xad   : > { %445 = vrot.lane.b32.xlu1 %v2134_v38, %s1696_s20 }
  0xae   : > { %v596_v21 = vpop.permute.xlu0 %595 }
  0xaf   : > { %636 = vst.msk [vmem:[#allocation2 + $0x20] sm:$0xf] %vm627_vm9, %v596_v21  ;;  %v586_v22 = vpop.permute.xlu1 %585 }
  0xb0   : > { %443 = vrot.lane.b32.xlu0 %v2138_v43, %s1696_s20  ;;  %631 = vst.msk [vmem:[#allocation2 + $0xc] sm:$0xf] %vm627_vm9, %v586_v22 }
  0xb1   : > { %461 = vrot.lane.b32.xlu1 %v2146_v48, %s1696_s20 }
  0xb2   : > { %v584_v24 = vpop.permute.xlu0 %583 }
  0xb3   : > { %630 = vst.msk [vmem:[#allocation2 + $0x8] sm:$0xf] %vm627_vm9, %v584_v24  ;;  %v602_v26 = vpop.permute.xlu1 %601 }
  0xb4   : > { %459 = vrot.lane.b32.xlu0 %v2150_v52, %s1696_s20  ;;  %639 = vst.msk [vmem:[#allocation2 + $0x2c] sm:$0xf] %vm627_vm9, %v602_v26 }
  0xb5   : > { %589 = vrot.lane.b32.xlu1 %v2069_v54, %s1695_s11 }
  0xb6   : > { %v600_v27 = vpop.permute.xlu0 %599 }
  0xb7   : > { %638 = vst.msk [vmem:[#allocation2 + $0x28] sm:$0xf] %vm627_vm9, %v600_v27  ;;  %v649_v29 = vpop.permute.xlu1 %648 }
  0xb8   : > { %587 = vrot.lane.b32.xlu0 %v2073_v53, %s1695_s11  ;;  %696 = vst.msk [vmem:[#allocation2 + $0x4] sm:$0xf] %vm694_vm10, %v649_v29 }
  0xb9   : > { %605 = vrot.lane.b32.xlu1 %v2082_v60, %s1695_s11 }
  0xba   : > { %v647_v31 = vpop.permute.xlu0 %646 }
  0xbb   : > { %695 = vst.msk [vmem:[#allocation2] sm:$0xf] %vm694_vm10, %v647_v31  ;;  %v665_v36 = vpop.permute.xlu1 %664 }
  0xbc   : > { %603 = vrot.lane.b32.xlu0 %v2086_v62, %s1695_s11  ;;  %704 = vst.msk [vmem:[#allocation2 + $0x24] sm:$0xf] %vm694_vm10, %v665_v36  ;;  %v1439_v36 = vrot.slane %v2279_v44, 9 }
  0xbd   : > { %593 = vrot.lane.b32.xlu1 %v2193_v37, %s1695_s11 }
  0xbe   : > { %v663_v54 = vpop.permute.xlu0 %662 }
  0xbf   : > { %703 = vst.msk [vmem:[#allocation2 + $0x20] sm:$0xf] %vm694_vm10, %v663_v54  ;;  %v653_v53 = vpop.permute.xlu1 %652 }
  0xc0   : > { %591 = vrot.lane.b32.xlu0 %v2198_v10, %s1695_s11  ;;  %698 = vst.msk [vmem:[#allocation2 + $0xc] sm:$0xf] %vm694_vm10, %v653_v53 }
  0xc1   : > { %609 = vrot.lane.b32.xlu1 %v2209_v18, %s1695_s11 }
  0xc2   : > { %v651_v14 = vpop.permute.xlu0 %650 }
  0xc3   : > { %697 = vst.msk [vmem:[#allocation2 + $0x8] sm:$0xf] %vm694_vm10, %v651_v14  ;;  %v669_v60 = vpop.permute.xlu1 %668 }
  0xc4   : > { %607 = vrot.lane.b32.xlu0 %v2213_v15, %s1695_s11  ;;  %706 = vst.msk [vmem:[#allocation2 + $0x2c] sm:$0xf] %vm694_vm10, %v669_v60 }
  0xc5   : > { %656 = vrot.lane.b32.xlu1 %v1914_v13, %s1697_s21 }
  0xc6   : > { %v667_v62 = vpop.permute.xlu0 %666 }
  0xc7   : > { %705 = vst.msk [vmem:[#allocation2 + $0x28] sm:$0xf] %vm694_vm10, %v667_v62  ;;  %v738_v39 = vpop.permute.xlu1 %737 }
  0xc8   : > { %654 = vrot.lane.b32.xlu0 %v1925_v17, %s1697_s21  ;;  %785 = vst.msk [vmem:[#allocation2 + $0x4] sm:$0xf] %vm783_vm11, %v738_v39  ;;  %v2274_v17 = vld [vmem:[%s1802_s10 + $0x64] sm:$0xf] }
  0xc9   : > { %672 = vrot.lane.b32.xlu1 %v1928_v19, %s1697_s21  ;;  %v721_v19 = vshll.u32 %v2274_v17, 16  ;;  %v803_v24 = vrot.slane %v2274_v17, 5 }
  0xca   : > { %v736_v46 = vpop.permute.xlu0 %735 }
  0xcb   : > { %784 = vst.msk [vmem:[#allocation2] sm:$0xf] %vm783_vm11, %v736_v46  ;;  %v754_v28 = vpop.permute.xlu1 %753  ;;  %v723_v63 = vrot.slane %v721_v19, 5  ;;  %v805_v29 = vrot.slane %v803_v24, 4  ;;  %v2350_v54 = vsel %vm1804_vm3, %v1439_v36, %v803_v24 }
  0xcc   : > { %670 = vrot.lane.b32.xlu0 %v1934_v25, %s1697_s21  ;;  %793 = vst.msk [vmem:[#allocation2 + $0x24] sm:$0xf] %vm783_vm11, %v754_v28  ;;  %v725_v25 = vshrl.u32 %v2274_v17, 16 }
  0xcd   : > { %660 = vrot.lane.b32.xlu1 %v1817_v9, %s1697_s21  ;;  %v2316_v16 = vsel %vm1853_vm6, %v719_v12, %v723_v63 }
  0xce   : > { %v752_v13 = vpop.permute.xlu0 %751  ;;  %v727_v1 = vrot.slane %v725_v25, 4 }
  0xcf   : > { %792 = vst.msk [vmem:[#allocation2 + $0x20] sm:$0xf] %vm783_vm11, %v752_v13  ;;  %v742_v49 = vpop.permute.xlu1 %741 }
  0xd0   : > { %658 = vrot.lane.b32.xlu0 %v1812_v7, %s1697_s21  ;;  %787 = vst.msk [vmem:[#allocation2 + $0xc] sm:$0xf] %vm783_vm11, %v742_v49  ;;  %v728_v5 = vor.u32 %v727_v1, %v723_v63  ;;  %v218_v63 = vld [vmem:[%s1802_s10 + $0x74] sm:$0x1] }
  0xd1   : > { %676 = vrot.lane.b32.xlu1 %v2274_v17, %s1697_s21 }
  0xd2   : > { %v740_v33 = vpop.permute.xlu0 %739 }
  0xd3   : > { %786 = vst.msk [vmem:[#allocation2 + $0x8] sm:$0xf] %vm783_vm11, %v740_v33  ;;  %v758_v50 = vpop.permute.xlu1 %757 }
  0xd4   : > { %674 = vrot.lane.b32.xlu0 %v2279_v44, %s1697_s21  ;;  %795 = vst.msk [vmem:[#allocation2 + $0x2c] sm:$0xf] %vm783_vm11, %v758_v50 }
  0xd5   : > { %745 = vrot.lane.b32.xlu1 %v2134_v38, %s1698_s24  ;;  %v729_v38 = vrot.slane %v728_v5, 4 }
  0xd6   : > { %v756_v4 = vpop.permute.xlu0 %755 }
  0xd7   : > { %794 = vst.msk [vmem:[#allocation2 + $0x28] sm:$0xf] %vm783_vm11, %v756_v4  ;;  %v811_v30 = vpop.permute.xlu1 %810 }
  0xd8   : > { %743 = vrot.lane.b32.xlu0 %v2138_v43, %s1698_s24  ;;  %858 = vst.msk [vmem:[#allocation2 + $0x4] sm:$0xf] %vm856_vm12, %v811_v30 }
  0xd9   : > { %761 = vrot.lane.b32.xlu1 %v2146_v48, %s1698_s24  ;;  %v2312_v48 = vsel %vm1853_vm6, %v729_v38, %v733_v11 }
  0xda   : > { %v809_v8 = vpop.permute.xlu0 %808 }
  0xdb   : > { %857 = vst.msk [vmem:[#allocation2] sm:$0xf] %vm856_vm12, %v809_v8  ;;  %v827_v40 = vpop.permute.xlu1 %826 }
  0xdc   : > { %759 = vrot.lane.b32.xlu0 %v2150_v52, %s1698_s24  ;;  %866 = vst.msk [vmem:[#allocation2 + $0x24] sm:$0xf] %vm856_vm12, %v827_v40 }
  0xdd   : > { %749 = vrot.lane.b32.xlu1 %v1907_v3, %s1698_s24 }
  0xde   : > { %v825_v43 = vpop.permute.xlu0 %824 }
  0xdf   : > { %865 = vst.msk [vmem:[#allocation2 + $0x20] sm:$0xf] %vm856_vm12, %v825_v43  ;;  %v815_v52 = vpop.permute.xlu1 %814 }
  0xe0   : > { %747 = vrot.lane.b32.xlu0 %v1877_v51, %s1698_s24  ;;  %860 = vst.msk [vmem:[#allocation2 + $0xc] sm:$0xf] %vm856_vm12, %v815_v52  ;;  %v1035_v52 = vrot.slane %v218_v63, 5 }
  0xe1   : > { %765 = vrot.lane.b32.xlu1 %v2312_v48, %s1698_s24 }
  0xe2   : > { %v813_v20 = vpop.permute.xlu0 %812 }
  0xe3   : > { %859 = vst.msk [vmem:[#allocation2 + $0x8] sm:$0xf] %vm856_vm12, %v813_v20  ;;  %v831_v21 = vpop.permute.xlu1 %830 }
  0xe4   : > { %763 = vrot.lane.b32.xlu0 %v2316_v16, %s1698_s24  ;;  %868 = vst.msk [vmem:[#allocation2 + $0x2c] sm:$0xf] %vm856_vm12, %v831_v21 }
  0xe5   : > { %818 = vrot.lane.b32.xlu1 %v2193_v37, %s1699_s27  ;;  %v806_v37 = vrot.slane %v215_v55, 5  ;;  %v960_v55 = vshll.u32 %v218_v63, 16 }
  0xe6   : > { %v829_v22 = vpop.permute.xlu0 %828 }
  0xe7   : > { %867 = vst.msk [vmem:[#allocation2 + $0x28] sm:$0xf] %vm856_vm12, %v829_v22  ;;  %v878_v26 = vpop.permute.xlu1 %877  ;;  %v962_v5 = vrot.slane %v960_v55, 5 }
  0xe8   : > { %816 = vrot.lane.b32.xlu0 %v2198_v10, %s1699_s27  ;;  %925 = vst.msk [vmem:[#allocation2 + $0x4] sm:$0xf] %vm923_vm13, %v878_v26 }
  0xe9   : > { %834 = vrot.lane.b32.xlu1 %v2209_v18, %s1699_s27  ;;  %v2346_v18 = vsel %vm1804_vm3, %v805_v29, %v806_v37 }
  0xea   : > { %v876_v27 = vpop.permute.xlu0 %875 }
  0xeb   : > { %924 = vst.msk [vmem:[#allocation2] sm:$0xf] %vm923_vm13, %v876_v27  ;;  %v894_v31 = vpop.permute.xlu1 %893 }
  0xec   : > { %832 = vrot.lane.b32.xlu0 %v2213_v15, %s1699_s27  ;;  %933 = vst.msk [vmem:[#allocation2 + $0x24] sm:$0xf] %vm923_vm13, %v894_v31 }
  0xed   : > { %822 = vrot.lane.b32.xlu1 %v1964_v42, %s1699_s27 }
  0xee   : > { %v892_v10 = vpop.permute.xlu0 %891 }
  0xef   : > { %932 = vst.msk [vmem:[#allocation2 + $0x20] sm:$0xf] %vm923_vm13, %v892_v10  ;;  %v882_v15 = vpop.permute.xlu1 %881 }
  0xf0   : > { %820 = vrot.lane.b32.xlu0 %v1970_v47, %s1699_s27  ;;  %927 = vst.msk [vmem:[#allocation2 + $0xc] sm:$0xf] %vm923_vm13, %v882_v15 }
  0xf1   : > { %838 = vrot.lane.b32.xlu1 %v2346_v18, %s1699_s27 }
  0xf2   : > { %v880_v53 = vpop.permute.xlu0 %879 }
  0xf3   : > { %926 = vst.msk [vmem:[#allocation2 + $0x8] sm:$0xf] %vm923_vm13, %v880_v53  ;;  %v898_v14 = vpop.permute.xlu1 %897 }
  0xf4   : > { %836 = vrot.lane.b32.xlu0 %v2350_v54, %s1699_s27  ;;  %935 = vst.msk [vmem:[#allocation2 + $0x2c] sm:$0xf] %vm923_vm13, %v898_v14 }
  0xf5   : > { %885 = vrot.lane.b32.xlu1 %v1817_v9, %s1700_s28 }
  0xf6   : > { %v896_v60 = vpop.permute.xlu0 %895 }
  0xf7   : > { %934 = vst.msk [vmem:[#allocation2 + $0x28] sm:$0xf] %vm923_vm13, %v896_v60  ;;  %v967_v62 = vpop.permute.xlu1 %966 }
  0xf8   : > { %883 = vrot.lane.b32.xlu0 %v1812_v7, %s1700_s28  ;;  %1014 = vst.msk [vmem:[#allocation2 + $0x4] sm:$0xf] %vm1012_vm14, %v967_v62  ;;  %v2375_v7 = vld [vmem:[%s1802_s10 + $0x70] sm:$0xf] }
  0xf9   : > { %901 = vrot.lane.b32.xlu1 %v2274_v17, %s1700_s28  ;;  %v950_v28 = vshll.u32 %v2375_v7, 16  ;;  %v954_v13 = vshrl.u32 %v2375_v7, 16  ;;  %v2382_v17 = vld [vmem:[%s1802_s10 + $0x6c] sm:$0xf]  ;;  %v1032_v35 = vrot.slane %v2375_v7, 5  ;;  %s175_s10 = sand.u32 1, %s1669_s13  }
  0xfa   : > { %v965_v39 = vpop.permute.xlu0 %964  ;;  %v941_v19 = vshrl.u32 %v2382_v17, 16  ;;  %v944_v25 = vshll.u32 %v2382_v17, 16  ;;  %s1426_s20 = sshll.u32 %s175_s10, 7  ;;  %s2549_s9 = scalar_lea.sflag [#allocation4], %s175_s10 }
  0xfb   : > { %1013 = vst.msk [vmem:[#allocation2] sm:$0xf] %vm1012_vm14, %v965_v39  ;;  %v983_v46 = vpop.permute.xlu1 %982  ;;  %v956_v49 = vrot.slane %v954_v13, 4  ;;  %s2519_s27 = scalar_lea.vmem [#allocation3], %s1426_s20  ;;  %s1703_s20 = smov [#allocation3]  }
  0xfc   : > { %899 = vrot.lane.b32.xlu0 %v2279_v44, %s1700_s28  ;;  %1022 = vst.msk [vmem:[#allocation2 + $0x24] sm:$0xf] %vm1012_vm14, %v983_v46  ;;  %v943_v59 = vrot.slane %v941_v19, 4  ;;  %v946_v23 = vrot.slane %v944_v25, 5  ;;  %s1605_s21 = sshll.u32 %s1703_s20, 4  ;;  %s1606_s21 = int_to_ptr.vmem [resolvable:$false] %s1605_s21 }
  0xfd   : > { %889 = vrot.lane.b32.xlu1 %v1849_v34, %s1700_s28  ;;  %s1607_s24 = scalar_lea.vmem %s1606_s21, 4096 }
  0xfe   : > { %v981_v9 = vpop.permute.xlu0 %980  ;;  %v947_v61 = vor.u32 %v946_v23, %v943_v59 }
  0xff   : > { %1021 = vst.msk [vmem:[#allocation2 + $0x20] sm:$0xf] %vm1012_vm14, %v981_v9  ;;  %v971_v44 = vpop.permute.xlu1 %970 }
 0x100   : > { %887 = vrot.lane.b32.xlu0 %v1867_v45, %s1700_s28  ;;  %1016 = vst.msk [vmem:[#allocation2 + $0xc] sm:$0xf] %vm1012_vm14, %v971_v44  ;;  %v952_v45 = vrot.slane %v950_v28, 5  ;;  %v948_v30 = vrot.slane %v947_v61, 4 }
 0x101   : > { %905 = vrot.lane.b32.xlu1 %v2375_v7, %s1700_s28 }
 0x102   : > { %v969_v34 = vpop.permute.xlu0 %968  ;;  %v957_v50 = vor.u32 %v956_v49, %v952_v45  ;;  %v953_v38 = vsel %vm1853_vm6, %v948_v30, %v952_v45 }
 0x103   : > { %1015 = vst.msk [vmem:[#allocation2 + $0x8] sm:$0xf] %vm1012_vm14, %v969_v34  ;;  %v987_v33 = vpop.permute.xlu1 %986 }
 0x104   : > { %903 = vrot.lane.b32.xlu0 %v2382_v17, %s1700_s28  ;;  %1024 = vst.msk [vmem:[#allocation2 + $0x2c] sm:$0xf] %vm1012_vm14, %v987_v33  ;;  %s1462_s28 = sshll.u32 %s1677_s15, 4 }
 0x105   : > { %974 = vrot.lane.b32.xlu1 %v1907_v3, %s1701_s29  ;;  %v958_v3 = vrot.slane %v957_v50, 4 }
 0x106   : > { %v985_v1 = vpop.permute.xlu0 %984 }
 0x107   : > { %1023 = vst.msk [vmem:[#allocation2 + $0x28] sm:$0xf] %vm1012_vm14, %v985_v1  ;;  %v1040_v56 = vpop.permute.xlu1 %1039  ;;  %v963_v2 = vsel %vm1853_vm6, %v958_v3, %v962_v5 }
 0x108   : > { %972 = vrot.lane.b32.xlu0 %v1877_v51, %s1701_s29  ;;  %1087 = vst.msk [vmem:[#allocation2 + $0x4] sm:$0xf] %vm1085_vm15, %v1040_v56 }
 0x109   : > { %990 = vrot.lane.b32.xlu1 %v2312_v48, %s1701_s29 }
 0x10a   : > { %v1038_v4 = vpop.permute.xlu0 %1037 }
 0x10b   : > { %1086 = vst.msk [vmem:[#allocation2] sm:$0xf] %vm1085_vm15, %v1038_v4  ;;  %v1056_v6 = vpop.permute.xlu1 %1055 }
 0x10c   : > { %988 = vrot.lane.b32.xlu0 %v2316_v16, %s1701_s29  ;;  %1095 = vst.msk [vmem:[#allocation2 + $0x24] sm:$0xf] %vm1085_vm15, %v1056_v6  ;;  %v1440_v16 = vrot.slane %v2382_v17, 9 }
 0x10d   : > { %978 = vrot.lane.b32.xlu1 %v1949_v32, %s1701_s29 }
 0x10e   : > { %v1054_v51 = vpop.permute.xlu0 %1053  ;;  %v1033_v24 = vsel %vm1804_vm3, %v1440_v16, %v1032_v35 }
 0x10f   : > { %1094 = vst.msk [vmem:[#allocation2 + $0x20] sm:$0xf] %vm1085_vm15, %v1054_v51  ;;  %v442_v8 = vpop.permute.xlu1 %441 }
 0x110   : > { %976 = vrot.lane.b32.xlu0 %v1958_v41, %s1701_s29  ;;  %485 = vst.msk [vmem:[#allocation2 + $0x14] sm:$0xf] %vm479_vm8, %v442_v8 }
 0x111   : > { %994 = vrot.lane.b32.xlu1 %v963_v2, %s1701_s29 }
 0x112   : > { %v440_v11 = vpop.permute.xlu0 %439  ;;  %v1590_v40 = vld [vmem:[#allocation2] sm:$0xff]  }
 0x113   : > { %484 = vst.msk [vmem:[#allocation2 + $0x10] sm:$0xf] %vm479_vm8, %v440_v11  ;;  %1485 = vmatprep.mubr.msk.bf16.mxu0 %vm1185_vm0, %v1590_v40  ;;  %v458_v32 = vpop.permute.xlu1 %457 }
 0x114   : > { %992 = vrot.lane.b32.xlu0 %v953_v38, %s1701_s29  ;;  %493 = vst.msk [vmem:[#allocation2 + $0x34] sm:$0xf] %vm479_vm8, %v458_v32  ;;  %s1463_s29 = sshll.u32 %s1681_s16, 5  ;;  %s1343_s16 = sshll.u32 %s2519_s27, 4  ;;  %s2544_s16 = int_to_ptr.vmem [resolvable:$true] %s1343_s16 }
 0x115   : > { %1047 = vrot.lane.b32.xlu1 %v1964_v42, %s1702_s6  ;;  %v1034_v42 = vrot.slane %v1032_v35, 4  ;;  %s1340_s5 = sadd.s32 %s1463_s29, %s1462_s28  ;;  %s1601_s4 = scalar_lea.vmem %s2544_s16, 2048 }
 0x116   : > { %v456_v41 = vpop.permute.xlu0 %455  ;;  %v1592_v12 = vld [vmem:[#allocation2 + $0x20] sm:$0xff]   ;;  %s1464_s15 = sshll.u32 %s1340_s5, 7  ;;  %p1602_p13 = scmp.ne.s32.totalorder %s2544_s16, %s1601_s4 }
 0x117   : > { %492 = vst.msk [vmem:[#allocation2 + $0x30] sm:$0xf] %vm479_vm8, %v456_v41  ;;  %1493 = vmatprep.mubr.msk.bf16.mxu1 %vm1185_vm0, %v1592_v12  ;;  %v1044_v43 = vpop.permute.xlu1 %1043  ;;  %v1036_v21 = vsel %vm1804_vm3, %v1034_v42, %v1035_v52  ;;  %s2541_s8 = scalar_lea.hbm %s2604_s3, %s1464_s15  ;;  %p1608_p2 = scmp.lt.s32.totalorder %s2544_s16, %s1606_s21 }
 0x118   : > { %1045 = vrot.lane.b32.xlu0 %v1970_v47, %s1702_s6  ;;  %1089 = vst.msk [vmem:[#allocation2 + $0xc] sm:$0xf] %vm1085_vm15, %v1044_v43  ;;  %p1603_p0 = pnand %p1602_p13, %p1776_p3  ;;  %p1609_p4 = scmp.lt.s32.totalorder %s1607_s24, %s1601_s4 }
 0x119   : > { %1063 = vrot.lane.b32.xlu1 %v2346_v18, %s1702_s6 }
 0x11a   : > { %v1042_v48 = vpop.permute.xlu0 %1041  ;;  %p1604_p1 = pneg %p1603_p0  ;;  %p1610_p5 = por %p1609_p4, %p1608_p2 }
 0x11b   : > { %1088 = vst.msk [vmem:[#allocation2 + $0x8] sm:$0xf] %vm1085_vm15, %v1042_v48  ;;  %v1060_v20 = vpop.permute.xlu1 %1059 }
 0x11c   : > { %1061 = vrot.lane.b32.xlu0 %v2350_v54, %s1702_s6  ;;  %1097 = vst.msk [vmem:[#allocation2 + $0x2c] sm:$0xf] %vm1085_vm15, %v1060_v20  ;;  %p1611_p6 = pnand %p1610_p5, %p1604_p1 }
 0x11d   : > { %1051 = vrot.lane.b32.xlu1 %v1990_v57, %s1702_s6 }
 0x11e   : > { %v1058_v47 = vpop.permute.xlu0 %1057 }
 0x11f   : > { %1096 = vst.msk [vmem:[#allocation2 + $0x28] sm:$0xf] %vm1085_vm15, %v1058_v47  ;;  %v446_v22 = vpop.permute.xlu1 %445 }
 0x120   : > { %1049 = vrot.lane.b32.xlu0 %v1994_v58, %s1702_s6  ;;  %487 = vst.msk [vmem:[#allocation2 + $0x1c] sm:$0xf] %vm479_vm8, %v446_v22 }
 0x121   : > { %1067 = vrot.lane.b32.xlu1 %v1036_v21, %s1702_s6 }
 0x122   : > { %v444_v26 = vpop.permute.xlu0 %443  ;;  %v1595_v27 = vld [vmem:[#allocation2 + $0x8] sm:$0xff]  }
 0x123   : > { %486 = vst.msk [vmem:[#allocation2 + $0x18] sm:$0xf] %vm479_vm8, %v444_v26  ;;  %1486 = vmatmul.mubr.msk.bf16.vlgmr.msra.gmra.mxu0 %vm1185_vm0, %v1595_v27  ;;  %v462_v57 = vpop.permute.xlu1 %461  ;;  %v1441_v27 = vld [vmem:[%s2603_s2] ss:$0 sm:$0xff] }
 0x124   : > { %1065 = vrot.lane.b32.xlu0 %v1033_v24, %s1702_s6  ;;  %495 = vst.msk [vmem:[#allocation2 + $0x3c] sm:$0xf] %vm479_vm8, %v462_v57 }
 0x126   : > { %v460_v58 = vpop.permute.xlu0 %459  ;;  %v1596_v29 = vld [vmem:[#allocation2 + $0x28] sm:$0xff]  }
 0x127   : > { %494 = vst.msk [vmem:[#allocation2 + $0x38] sm:$0xf] %vm479_vm8, %v460_v58  ;;  %1494 = vmatmul.mubr.msk.bf16.vlgmr.msra.gmra.mxu1 %vm1185_vm0, %v1596_v29  ;;  %v590_v0 = vpop.permute.xlu1 %589 }
 0x128   : > { %633 = vst.msk [vmem:[#allocation2 + $0x14] sm:$0xf] %vm627_vm9, %v590_v0 }
 0x12a   : > { %v588_v37 = vpop.permute.xlu0 %587 }
 0x12b   : > { %632 = vst.msk [vmem:[#allocation2 + $0x10] sm:$0xf] %vm627_vm9, %v588_v37  ;;  %v606_v31 = vpop.permute.xlu1 %605 }
 0x12c   : > { %641 = vst.msk [vmem:[#allocation2 + $0x34] sm:$0xf] %vm627_vm9, %v606_v31 }
 0x12e   : > { %v604_v36 = vpop.permute.xlu0 %603 }
 0x12f   : > { %640 = vst.msk [vmem:[#allocation2 + $0x30] sm:$0xf] %vm627_vm9, %v604_v36  ;;  %v594_v10 = vpop.permute.xlu1 %593 }
 0x130   : > { %635 = vst.msk [vmem:[#allocation2 + $0x1c] sm:$0xf] %vm627_vm9, %v594_v10 }
 0x132   : > { %v592_v18 = vpop.permute.xlu0 %591 }
 0x133   : > { %634 = vst.msk [vmem:[#allocation2 + $0x18] sm:$0xf] %vm627_vm9, %v592_v18  ;;  %v610_v15 = vpop.permute.xlu1 %609 }
 0x134   : > { %643 = vst.msk [vmem:[#allocation2 + $0x3c] sm:$0xf] %vm627_vm9, %v610_v15 }
 0x136   : > { %v608_v54 = vpop.permute.xlu0 %607 }
 0x137   : > { %642 = vst.msk [vmem:[#allocation2 + $0x38] sm:$0xf] %vm627_vm9, %v608_v54  ;;  %v657_v53 = vpop.permute.xlu1 %656 }
 0x138   : > { %700 = vst.msk [vmem:[#allocation2 + $0x14] sm:$0xf] %vm694_vm10, %v657_v53 }
 0x13a   : > { %v655_v14 = vpop.permute.xlu0 %654 }
 0x13b   : > { %699 = vst.msk [vmem:[#allocation2 + $0x10] sm:$0xf] %vm694_vm10, %v655_v14  ;;  %v673_v60 = vpop.permute.xlu1 %672 }
 0x13c   : > { %708 = vst.msk [vmem:[#allocation2 + $0x34] sm:$0xf] %vm694_vm10, %v673_v60 }
 0x13e   : > { %v671_v62 = vpop.permute.xlu0 %670 }
 0x13f   : > { %707 = vst.msk [vmem:[#allocation2 + $0x30] sm:$0xf] %vm694_vm10, %v671_v62  ;;  %v661_v39 = vpop.permute.xlu1 %660 }
 0x140   : > { %702 = vst.msk [vmem:[#allocation2 + $0x1c] sm:$0xf] %vm694_vm10, %v661_v39 }
 0x142   : > { %v659_v46 = vpop.permute.xlu0 %658 }
 0x143   : > { %701 = vst.msk [vmem:[#allocation2 + $0x18] sm:$0xf] %vm694_vm10, %v659_v46  ;;  %v677_v9 = vpop.permute.xlu1 %676 }
 0x144   : > { %710 = vst.msk [vmem:[#allocation2 + $0x3c] sm:$0xf] %vm694_vm10, %v677_v9 }
 0x146   : > { %v675_v7 = vpop.permute.xlu0 %674 }
 0x147   : > { %709 = vst.msk [vmem:[#allocation2 + $0x38] sm:$0xf] %vm694_vm10, %v675_v7  ;;  %v746_v28 = vpop.permute.xlu1 %745 }
 0x148   : > { %789 = vst.msk [vmem:[#allocation2 + $0x14] sm:$0xf] %vm783_vm11, %v746_v28 }
 0x14a   : > { %v744_v13 = vpop.permute.xlu0 %743 }
 0x14b   : > { %788 = vst.msk [vmem:[#allocation2 + $0x10] sm:$0xf] %vm783_vm11, %v744_v13  ;;  %v762_v17 = vpop.permute.xlu1 %761 }
 0x14c   : > { %797 = vst.msk [vmem:[#allocation2 + $0x34] sm:$0xf] %vm783_vm11, %v762_v17 }
 0x14e   : > { %v760_v44 = vpop.permute.xlu0 %759 }
 0x14f   : > { %796 = vst.msk [vmem:[#allocation2 + $0x30] sm:$0xf] %vm783_vm11, %v760_v44  ;;  %v750_v19 = vpop.permute.xlu1 %749 }
 0x150   : > { %791 = vst.msk [vmem:[#allocation2 + $0x1c] sm:$0xf] %vm783_vm11, %v750_v19 }
 0x152   : > { %v748_v25 = vpop.permute.xlu0 %747 }
 0x153   : > { %790 = vst.msk [vmem:[#allocation2 + $0x18] sm:$0xf] %vm783_vm11, %v748_v25  ;;  %v766_v34 = vpop.permute.xlu1 %765 }
 0x154   : > { %799 = vst.msk [vmem:[#allocation2 + $0x3c] sm:$0xf] %vm783_vm11, %v766_v34 }
 0x156   : > { %v764_v45 = vpop.permute.xlu0 %763 }
 0x157   : > { %798 = vst.msk [vmem:[#allocation2 + $0x38] sm:$0xf] %vm783_vm11, %v764_v45  ;;  %v819_v49 = vpop.permute.xlu1 %818 }
 0x158   : > { %862 = vst.msk [vmem:[#allocation2 + $0x14] sm:$0xf] %vm856_vm12, %v819_v49 }
 0x15a   : > { %v817_v59 = vpop.permute.xlu0 %816 }
 0x15b   : > { %861 = vst.msk [vmem:[#allocation2 + $0x10] sm:$0xf] %vm856_vm12, %v817_v59  ;;  %v835_v23 = vpop.permute.xlu1 %834 }
 0x15c   : > { %870 = vst.msk [vmem:[#allocation2 + $0x34] sm:$0xf] %vm856_vm12, %v835_v23 }
 0x15e   : > { %v833_v33 = vpop.permute.xlu0 %832 }
 0x15f   : > { %869 = vst.msk [vmem:[#allocation2 + $0x30] sm:$0xf] %vm856_vm12, %v833_v33  ;;  %v823_v63 = vpop.permute.xlu1 %822 }
 0x160   : > { %864 = vst.msk [vmem:[#allocation2 + $0x1c] sm:$0xf] %vm856_vm12, %v823_v63 }
 0x162   : > { %v821_v1 = vpop.permute.xlu0 %820 }
 0x163   : > { %863 = vst.msk [vmem:[#allocation2 + $0x18] sm:$0xf] %vm856_vm12, %v821_v1  ;;  %v839_v50 = vpop.permute.xlu1 %838 }
 0x164   : > { %872 = vst.msk [vmem:[#allocation2 + $0x3c] sm:$0xf] %vm856_vm12, %v839_v50 }
 0x166   : > { %v837_v55 = vpop.permute.xlu0 %836 }
 0x167   : > { %871 = vst.msk [vmem:[#allocation2 + $0x38] sm:$0xf] %vm856_vm12, %v837_v55  ;;  %v886_v56 = vpop.permute.xlu1 %885 }
 0x168   : > { %929 = vst.msk [vmem:[#allocation2 + $0x14] sm:$0xf] %vm923_vm13, %v886_v56 }
 0x16a   : > { %v884_v61 = vpop.permute.xlu0 %883 }
 0x16b   : > { %928 = vst.msk [vmem:[#allocation2 + $0x10] sm:$0xf] %vm923_vm13, %v884_v61  ;;  %v902_v4 = vpop.permute.xlu1 %901 }
 0x16c   : > { %937 = vst.msk [vmem:[#allocation2 + $0x34] sm:$0xf] %vm923_vm13, %v902_v4 }
 0x16e   : > { %v900_v3 = vpop.permute.xlu0 %899 }
 0x16f   : > { %936 = vst.msk [vmem:[#allocation2 + $0x30] sm:$0xf] %vm923_vm13, %v900_v3  ;;  %v890_v5 = vpop.permute.xlu1 %889 }
 0x170   : > { %931 = vst.msk [vmem:[#allocation2 + $0x1c] sm:$0xf] %vm923_vm13, %v890_v5 }
 0x172   : > { %v888_v6 = vpop.permute.xlu0 %887 }
 0x173   : > { %930 = vst.msk [vmem:[#allocation2 + $0x18] sm:$0xf] %vm923_vm13, %v888_v6  ;;  %v906_v30 = vpop.permute.xlu1 %905 }
 0x174   : > { %939 = vst.msk [vmem:[#allocation2 + $0x3c] sm:$0xf] %vm923_vm13, %v906_v30 }
 0x176   : > { %v904_v51 = vpop.permute.xlu0 %903 }
 0x177   : > { %938 = vst.msk [vmem:[#allocation2 + $0x38] sm:$0xf] %vm923_vm13, %v904_v51  ;;  %v975_v2 = vpop.permute.xlu1 %974 }
 0x178   : > { %1018 = vst.msk [vmem:[#allocation2 + $0x14] sm:$0xf] %vm1012_vm14, %v975_v2 }
 0x17a   : > { %v973_v8 = vpop.permute.xlu0 %972 }
 0x17b   : > { %1017 = vst.msk [vmem:[#allocation2 + $0x10] sm:$0xf] %vm1012_vm14, %v973_v8  ;;  %v991_v38 = vpop.permute.xlu1 %990 }
 0x17c   : > { %1026 = vst.msk [vmem:[#allocation2 + $0x34] sm:$0xf] %vm1012_vm14, %v991_v38 }
 0x17e   : > { %v989_v11 = vpop.permute.xlu0 %988 }
 0x17f   : > { %1025 = vst.msk [vmem:[#allocation2 + $0x30] sm:$0xf] %vm1012_vm14, %v989_v11  ;;  %v979_v40 = vpop.permute.xlu1 %978 }
 0x180   : > { %1020 = vst.msk [vmem:[#allocation2 + $0x1c] sm:$0xf] %vm1012_vm14, %v979_v40 }
 0x182   : > { %v977_v32 = vpop.permute.xlu0 %976 }
 0x183   : > { %1019 = vst.msk [vmem:[#allocation2 + $0x18] sm:$0xf] %vm1012_vm14, %v977_v32  ;;  %v995_v41 = vpop.permute.xlu1 %994 }
 0x184   : > { %1028 = vst.msk [vmem:[#allocation2 + $0x3c] sm:$0xf] %vm1012_vm14, %v995_v41 }
 0x186   : > { %v993_v12 = vpop.permute.xlu0 %992 }
 0x187   : > { %1027 = vst.msk [vmem:[#allocation2 + $0x38] sm:$0xf] %vm1012_vm14, %v993_v12  ;;  %v1048_v35 = vpop.permute.xlu1 %1047 }
 0x188   : > { %1091 = vst.msk [vmem:[#allocation2 + $0x14] sm:$0xf] %vm1085_vm15, %v1048_v35 }
 0x18a   : > { %v1046_v43 = vpop.permute.xlu0 %1045 }
 0x18b   : > { %1090 = vst.msk [vmem:[#allocation2 + $0x10] sm:$0xf] %vm1085_vm15, %v1046_v43  ;;  %v1064_v48 = vpop.permute.xlu1 %1063 }
 0x18c   : > { %1099 = vst.msk [vmem:[#allocation2 + $0x34] sm:$0xf] %vm1085_vm15, %v1064_v48 }
 0x18e   : > { %v1062_v42 = vpop.permute.xlu0 %1061 }
 0x18f   : > { %1098 = vst.msk [vmem:[#allocation2 + $0x30] sm:$0xf] %vm1085_vm15, %v1062_v42  ;;  %v1052_v52 = vpop.permute.xlu1 %1051 }
 0x190   : > { %1093 = vst.msk [vmem:[#allocation2 + $0x1c] sm:$0xf] %vm1085_vm15, %v1052_v52 }
 0x192   : > { %v1050_v16 = vpop.permute.xlu0 %1049  ;;  %v1597_v20 = vld [vmem:[#allocation2 + $0x10] sm:$0xff]  }
 0x193   : > { %1092 = vst.msk [vmem:[#allocation2 + $0x18] sm:$0xf] %vm1085_vm15, %v1050_v16  ;;  %1489 = vmatprep.mubr.msk.bf16.mxu0 %vm1185_vm0, %v1597_v20  ;;  %v1068_v47 = vpop.permute.xlu1 %1067 }
 0x194   : > { %1101 = vst.msk [vmem:[#allocation2 + $0x3c] sm:$0xf] %vm1085_vm15, %v1068_v47 }
 0x196   : > { %v1066_v21 = vpop.permute.xlu0 %1065  ;;  %v1598_v22 = vld [vmem:[#allocation2 + $0x30] sm:$0xff]  }
 0x197   : > { %1100 = vst.msk [vmem:[#allocation2 + $0x38] sm:$0xf] %vm1085_vm15, %v1066_v21  ;;  %1497 = vmatprep.mubr.msk.bf16.mxu1 %vm1185_vm0, %v1598_v22 }
 0x19a   : > { %v1599_v24 = vld [vmem:[#allocation2 + $0x18] sm:$0xff]  }
 0x19b   : > { %1490 = vmatmul.mubr.msk.bf16.gmra.mxu0 %vm1185_vm0, %v1599_v24 }
 0x19e   : > { %v1600_v26 = vld [vmem:[#allocation2 + $0x38] sm:$0xff]  }
 0x19f   : > { %1498 = vmatmul.mubr.msk.bf16.gmra.mxu1 %vm1185_vm0, %v1600_v26 }
 0x1e3   : > { %v1487_v57 = vpop.f32.mrf.mxu0 }
 0x1e4   : > { %v1257_v58 = vadd.f32 %v1487_v57, %v1441_v27 }
 0x1e5   : > { %v1248_v29 = vpop.f32.mrf.mxu0 }
 0x1e6   : > { %1313 = vst [vmem:[%s2519_s27 + $0x10] sm:$0xff] %v1257_v58  ;;  %v1249_v0 = vadd.f32 %v1441_v27, %v1248_v29 }
 0x1e7   : > { %v1488_v37 = vpop.f32.mrf.mxu0  ;;  %v1495_v31 = vpop.f32.mrf.mxu1 }
 0x1e8   : > { %1311 = vst [vmem:[%s2519_s27] sm:$0xff] %v1249_v0  ;;  %v1260_v36 = vadd.f32 %v1488_v37, %v1441_v27  ;;  %v1289_v10 = vadd.f32 %v1495_v31, %v1441_v27 }
 0x1e9   : > { %v1251_v18 = vpop.f32.mrf.mxu0  ;;  %v1280_v15 = vpop.f32.mrf.mxu1 }
 0x1ea   : > { %1314 = vst [vmem:[%s2519_s27 + $0x18] sm:$0xff] %v1260_v36  ;;  %1321 = vst [vmem:[%s2519_s27 + $0x50] sm:$0xff] %v1289_v10  ;;  %v1252_v54 = vadd.f32 %v1441_v27, %v1251_v18  ;;  %v1281_v53 = vadd.f32 %v1441_v27, %v1280_v15 }
 0x1eb   : > { %v1496_v14 = vpop.f32.mrf.mxu1 }
 0x1ec   : > { %1312 = vst [vmem:[%s2519_s27 + $0x8] sm:$0xff] %v1252_v54  ;;  %1319 = vst [vmem:[%s2519_s27 + $0x40] sm:$0xff] %v1281_v53  ;;  %v1292_v60 = vadd.f32 %v1496_v14, %v1441_v27 }
 0x1ed   : > { %v1283_v62 = vpop.f32.mrf.mxu1 }
 0x1ee   : > { %1322 = vst [vmem:[%s2519_s27 + $0x58] sm:$0xff] %v1292_v60  ;;  %v1284_v39 = vadd.f32 %v1441_v27, %v1283_v62 }
 0x1f0   : > { %1320 = vst [vmem:[%s2519_s27 + $0x48] sm:$0xff] %v1284_v39 }
 0x25b   : > { %v1491_v46 = vpop.f32.mrf.mxu0 }
 0x25c   : > { %v1273_v9 = vadd.f32 %v1491_v46, %v1441_v27 }
 0x25d   : > { %v1264_v7 = vpop.f32.mrf.mxu0 }
 0x25e   : > { %1317 = vst [vmem:[%s2519_s27 + $0x30] sm:$0xff] %v1273_v9  ;;  %v1265_v28 = vadd.f32 %v1441_v27, %v1264_v7 }
 0x25f   : > { %v1492_v13 = vpop.f32.mrf.mxu0  ;;  %v1499_v17 = vpop.f32.mrf.mxu1 }
 0x260   : > { %1315 = vst [vmem:[%s2519_s27 + $0x20] sm:$0xff] %v1265_v28  ;;  %v1276_v44 = vadd.f32 %v1492_v13, %v1441_v27  ;;  %v1305_v19 = vadd.f32 %v1499_v17, %v1441_v27 }
 0x261   : > { %v1267_v25 = vpop.f32.mrf.mxu0  ;;  %v1296_v34 = vpop.f32.mrf.mxu1 }
 0x262   : > { %1318 = vst [vmem:[%s2519_s27 + $0x38] sm:$0xff] %v1276_v44  ;;  %1325 = vst [vmem:[%s2519_s27 + $0x70] sm:$0xff] %v1305_v19  ;;  %v1268_v45 = vadd.f32 %v1441_v27, %v1267_v25  ;;  %v1297_v49 = vadd.f32 %v1441_v27, %v1296_v34 }
 0x263   : > { %v1500_v59 = vpop.f32.mrf.mxu1 }
 0x264   : > { %1316 = vst [vmem:[%s2519_s27 + $0x28] sm:$0xff] %v1268_v45  ;;  %1323 = vst [vmem:[%s2519_s27 + $0x60] sm:$0xff] %v1297_v49  ;;  %v1308_v23 = vadd.f32 %v1500_v59, %v1441_v27 }
 0x265   : > { %v1299_v33 = vpop.f32.mrf.mxu1 }
 0x266   : > { %1326 = vst [vmem:[%s2519_s27 + $0x78] sm:$0xff] %v1308_v23  ;;  %v1300_v63 = vadd.f32 %v1441_v27, %v1299_v33 }
 0x268   : > { %1324 = vst [vmem:[%s2519_s27 + $0x68] sm:$0xff] %v1300_v63 }
 0x269   : > { %1614 = shalt.err (!%p1611_p6)
}
 0x26a   : > { %s1615_s10 = scalar_lea.hbm %s2541_s8, 2048  ;;  %s1619_s29 = scalar_lea.hbm %s2604_s3, 8192 }
 0x26b   : > { %p1616_p7 = scmp.ne.s32.totalorder %s2541_s8, %s1615_s10  ;;  %p1620_p11 = scmp.lt.s32.totalorder %s2541_s8, %s2604_s3 }
 0x26c   : > { %p1621_p12 = scmp.lt.s32.totalorder %s1619_s29, %s1615_s10 }
 0x26d   : > { %p1617_p9 = pnand %p1616_p7, %p1776_p3 }
 0x26e   : > { %p1622_p13 = por %p1621_p12, %p1620_p11 }
 0x26f   : > { %p1618_p10 = pneg %p1617_p9 }
 0x271   : > { %p1623_p0 = pnand %p1622_p13, %p1618_p10 }
 0x273   : > { %1626 = shalt.err (!%p1623_p0)
}
 0x274   : > { %s1704_s6 = smov 128  }
 0x275   : > { %1510 = dma.vmem_to_hbm [thread:$0]  (%p1776_p3), %s2544_s16, 2048, %s2541_s8, %s2549_s9, %s1704_s6, %s1704_s6, %s1695_s11  }
 0x276 PF: > { %p1516_p1 = scmp.ge.s32.totalorder %s1693_s19, 2  ;;  %s1358_s7 = sand.u32 1, %s1665_s12  }
 0x277   : > { %s1359_s4 = scalar_lea.sflag [#allocation4], %s1358_s7 }
 0x278   : > { %p1513_p2 = pnand %p1516_p1, %p1785_p8 }
 0x27a   : > { %p1514_p4 = pneg %p1513_p2 }
 0x27c   : > { %1660 = dma.done.wait (%p1514_p4), %s1359_s4, 2048  }
 0x27d   : > { %1662 = vsyncadd (%p1514_p4), %s1359_s4, 4294965248  ;;  %s16_s19 = sadd.s32 1, %s1693_s19   ;;  %s2611_s12 = smov %s1669_s13 }
 0x27e   : > { %p13_p5 = scmp.ge.s32.totalorder %s16_s19, 6   ;;  %s2612_s13 = smov %s1673_s14 }
 0x27f   : > { %s2613_s14 = smov %s1794_s30  ;;  %s2614_s15 = smov %s1685_s17 }
 0x280   : > { %s2615_s16 = smov %s1689_s18  ;;  %s2616_s17 = smov %s2619_s22 }
 0x281   : > { %s2617_s18 = smov %s2623_s23  ;;  %15 = sbr.rel (!%p13_p5) target bundleno = 5 (0x5), region = 68 }
 0x286   :  { %1364 = vsyncpa [#allocation4], 1 }
 0x287   :  { %1366 = vsyncpa [#allocation4 + $0x1], 1 }

</bundles_post_ra>
